<compile_context>
chip_gen: v6e
topology: v6e:2x2x1
jax: 0.10.0
libtpu: 0.0.40
codegen_flags: <defaults>
</compile_context>

<pallas_src>
import numpy as np
import jax
import jax.numpy as jnp
from jax import lax
from jax.experimental import pallas as pl
from jax.experimental.pallas import tpu as pltpu

KSIZE = 3  # 3x3 conv, padding=1 ("same")


# ----------------------------------------------------------------------------- #
# Host-side constant folding helpers
# ----------------------------------------------------------------------------- #
def _round_up(n, m):
    return ((n + m - 1) // m) * m


def _nearest_src(out_size, in_size):
    # PyTorch nn.Upsample(mode='nearest'): src = floor(dst * in / out).
    return (np.arange(out_size) * in_size) // out_size


def _tap_select(out_size, in_size):
    """S[k, h, j] = 1 iff 0 <= j+k-1 < out_size and nearest_src(j+k-1) == h.

    Folds (nearest upsample) + (zero 'same' halo) + (k-th conv tap) into one 0/1
    selection matrix along a single spatial axis.
    """
    src = _nearest_src(out_size, in_size)
    s = np.zeros((KSIZE, in_size, out_size), dtype=np.float32)
    j = np.arange(out_size)
    for k in range(KSIZE):
        r = j + k - 1
        valid = (r >= 0) & (r < out_size)
        s[k, src[r[valid]], j[valid]] = 1.0
    return s


def _vmem_budget():
    """(physical VMEM, per-step block budget) — generation aware."""
    try:
        cap = int(pltpu.get_tpu_info().vmem_capacity_bytes)
    except Exception:  # pragma: no cover - conservative fallback
        cap = 64 * 2**20
    budget = max(8 * 2**20, min(int(0.35 * cap), 48 * 2**20))
    return cap, budget


def _pick_block(n_images, footprint_fn, budget, row_aligned):
    """Largest divisor of n_images whose full per-step footprint fits the budget.

    Fewer, fatter grid steps are preferred (per-step overhead ~0.35us dominates at
    small sizes; single-TC chips gain nothing from extra steps).  `row_aligned`
    enforces the (8,128) sublane rule when the image count is the 2nd-minor dim.
    """
    cands = [d for d in range(n_images, 0, -1)
             if n_images % d == 0 and (not row_aligned or d == n_images or d % 8 == 0)]
    for d in cands:  # largest first
        if footprint_fn(d) <= budget:
            return d
    return cands[-1]  # smallest valid block; the footprint estimate is conservative


# ----------------------------------------------------------------------------- #
# Kernels
# ----------------------------------------------------------------------------- #
def _folded_kernel(x_ref, w_ref, b_ref, o_ref):
    """Fully-folded path: ONE matmul per grid step.

    x_ref: (Nb, Kp)        flattened original images (zero lane padding)
    w_ref: (Kp, ColsP)     upsample+halo+3x3 conv fully folded, lane padded
    b_ref: (1, ColsP)      bias tiled over (Hn, Wn), lane padded (f32)
    o_ref: (Nb, ColsP)     lane-dense output block
    """
    acc = jnp.dot(x_ref[...].astype(w_ref.dtype), w_ref[...],
                  preferred_element_type=jnp.float32)
    o_ref[...] = (acc + b_ref[...]).astype(o_ref.dtype)


def _general_kernel(x_ref, gk_ref, w_ref, b_ref, o_ref):
    """General path: one batched block-diag H-gather matmul + 3 folded-W matmuls.

    x_ref : (Nb, H, WCp)             original images (lanes zero-padded to 128x)
    gk_ref: (3*Nb*Hn, Nb*H)          block-diag 0/1: H-upsample + H-halo + kh taps
    w_ref : (3, WCp, ColsP)          per-kh conv weight with W-upsample/halo/kw folded
    b_ref : (1, ColsP)               bias tiled over Wn (f32)
    o_ref : (Nb, Hn, ColsP)          lane-dense output block
    """
    nb, h, wcp = x_ref.shape
    hn = o_ref.shape[1]
    r = nb * hn

    xin = x_ref[...].reshape(nb * h, wcp)
    # Single batched 0/1 gather-as-matmul (exact in f32); replaces the per-image
    # loop of tiny K=H matmuls and the growing lane-concat of the old kernel.
    y = jnp.dot(gk_ref[...], xin, preferred_element_type=jnp.float32)  # (3*Nb*Hn, WCp)
    y = y.astype(w_ref.dtype)

    acc = jnp.dot(y[0:r], w_ref[0], preferred_element_type=jnp.float32)
    acc = acc + jnp.dot(y[r:2 * r], w_ref[1], preferred_element_type=jnp.float32)
    acc = acc + jnp.dot(y[2 * r:3 * r], w_ref[2], preferred_element_type=jnp.float32)
    acc = acc + b_ref[...]
    o_ref[...] = acc.reshape(o_ref.shape).astype(o_ref.dtype)


# ----------------------------------------------------------------------------- #
# Wrapper
# ----------------------------------------------------------------------------- #
def upsample3d_layer(x, weight, bias, target_size, *, compute_dtype=None,
                     force_general=False):
    """Forward of Upsample3DLayer (layout='THWC', temporal_upsample=False).

    x: (B, T, H, W, C); weight: (3, 3, C, out_dim) [HWIO]; bias: (out_dim,)
    target_size: (T_new, H_new, W_new) with T_new == T.
    Returns (B, T_new, H_new, W_new, out_dim).
    """
    B, T, H, W, C = x.shape
    Tn, Hn, Wn = target_size
    assert Tn == T, "non-temporal upsample requires target_size[0] == T"
    assert weight.shape[0] == KSIZE and weight.shape[1] == KSIZE and weight.shape[2] == C
    Cout = weight.shape[-1]
    N = B * T

    csize = jnp.dtype(compute_dtype).itemsize if compute_dtype is not None else 4
    xsize = x.dtype.itemsize
    vmem_cap, budget = _vmem_budget()

    SH = _tap_select(Hn, H)   # (3, H, Hn)
    SW = _tap_select(Wn, W)   # (3, W, Wn)

    # ------------------------------------------------------------------ folded
    K_fold = H * W * C
    cols_fold = Hn * Wn * Cout
    Kp_fold = _round_up(K_fold, 128)
    colsP_fold = _round_up(cols_fold, 128)
    folded_w_bytes = Kp_fold * colsP_fold * csize
    use_folded = (not force_general) and (folded_w_bytes <= budget // 3)

    if use_folded:
        # Fold H/W upsample + halo + all 9 taps into one constant matrix.
        w_big = jnp.einsum('khj,lwi,klcd->hwcjid',
                           jnp.asarray(SH), jnp.asarray(SW),
                           weight.astype(jnp.float32)).reshape(K_fold, cols_fold)
        w_big = jnp.pad(w_big, ((0, Kp_fold - K_fold), (0, colsP_fold - cols_fold)))
        if compute_dtype is not None:
            w_big = w_big.astype(compute_dtype)
        bias_row = jnp.pad(jnp.tile(bias.astype(jnp.float32), Hn * Wn),
                           (0, colsP_fold - cols_fold)).reshape(1, colsP_fold)
        x_flat = jnp.pad(x.reshape(N, K_fold), ((0, 0), (0, Kp_fold - K_fold)))

        def footprint(nb):
            return (2 * nb * Kp_fold * xsize            # input block (double buffered)
                    + 2 * nb * colsP_fold * xsize       # output block
                    + 2 * Kp_fold * colsP_fold * csize  # folded weight (grid invariant)
                    + 2 * colsP_fold * 4                # bias
                    + nb * colsP_fold * 4               # f32 accumulator
                    + nb * Kp_fold * max(csize, xsize)) # cast copy of the input

        Nb = _pick_block(N, footprint, budget, row_aligned=True)
        grid = N // Nb
        vmem_limit = int(min(vmem_cap - (4 << 20),
                             max(32 * 2**20, (footprint(Nb) * 3) // 2)))

        out2 = pl.pallas_call(
            _folded_kernel,
            out_shape=jax.ShapeDtypeStruct((N, colsP_fold), x.dtype),
            grid_spec=pltpu.PrefetchScalarGridSpec(
                num_scalar_prefetch=0,
                grid=(grid,),
                in_specs=[
                    pl.BlockSpec((Nb, Kp_fold), lambda i: (i, 0)),
                    pl.BlockSpec((Kp_fold, colsP_fold), lambda i: (0, 0)),
                    pl.BlockSpec((1, colsP_fold), lambda i: (0, 0)),
                ],
                out_specs=pl.BlockSpec((Nb, colsP_fold), lambda i: (i, 0)),
            ),
            compiler_params=pltpu.CompilerParams(
                dimension_semantics=("parallel",),
                vmem_limit_bytes=vmem_limit,
            ),
        )(x_flat, w_big, bias_row)
        return out2[:, :cols_fold].reshape(B, Tn, Hn, Wn, Cout)

    # ----------------------------------------------------------------- general
    WC = W * C
    WCp = _round_up(WC, 128)
    cols = Wn * Cout
    colsP = _round_up(cols, 128)

    # Per-kh conv weight with the W upsample / halo / kw taps folded in; zero-pad
    # rows (W*C) and columns (Wn*Cout) to 128-lane multiples (unmasked vregs).
    wk = jnp.einsum('lwi,klcd->kwcid', jnp.asarray(SW),
                    weight.astype(jnp.float32)).reshape(KSIZE, WC, cols)
    wk = jnp.pad(wk, ((0, 0), (0, WCp - WC), (0, colsP - cols)))
    if compute_dtype is not None:
        wk = wk.astype(compute_dtype)
    bias_row = jnp.pad(jnp.tile(bias.astype(jnp.float32), Wn),
                       (0, colsP - cols)).reshape(1, colsP)
    x3 = jnp.pad(x.reshape(N, H, WC), ((0, 0), (0, 0), (0, WCp - WC)))

    def footprint(nb):
        return (2 * nb * H * WCp * xsize                 # input block
                + 2 * nb * Hn * colsP * xsize            # output block
                + 2 * KSIZE * WCp * colsP * csize        # folded conv weights
                + 2 * KSIZE * nb * Hn * nb * H * 4       # block-diag gather matrix
                + 2 * colsP * 4                          # bias
                + KSIZE * nb * Hn * WCp * (4 + csize)    # gathered patch (f32 + cast)
                + nb * Hn * colsP * 4)                   # f32 accumulator

    Nb = _pick_block(N, footprint, budget, row_aligned=False)
    grid = N // Nb
    vmem_limit = int(min(vmem_cap - (4 << 20),
                         max(32 * 2**20, (footprint(Nb) * 3) // 2)))

    # Block-diagonal 0/1 gather (H-upsample + halo + kh taps) for a block of Nb
    # images: rows ordered (kh, n, ho), columns ordered (n, h).
    gk = np.einsum('khj,nm->knjmh', SH, np.eye(Nb, dtype=np.float32))
    gk = jnp.asarray(gk.reshape(KSIZE * Nb * Hn, Nb * H))

    out3 = pl.pallas_call(
        _general_kernel,
        out_shape=jax.ShapeDtypeStruct((N, Hn, colsP), x.dtype),
        grid_spec=pltpu.PrefetchScalarGridSpec(
            num_scalar_prefetch=0,
            grid=(grid,),
            in_specs=[
                pl.BlockSpec((Nb, H, WCp), lambda i: (i, 0, 0)),
                pl.BlockSpec((KSIZE * Nb * Hn, Nb * H), lambda i: (0, 0)),
                pl.BlockSpec((KSIZE, WCp, colsP), lambda i: (0, 0, 0)),
                pl.BlockSpec((1, colsP), lambda i: (0, 0)),
            ],
            out_specs=pl.BlockSpec((Nb, Hn, colsP), lambda i: (i, 0, 0)),
        ),
        compiler_params=pltpu.CompilerParams(
            dimension_semantics=("parallel",),
            vmem_limit_bytes=vmem_limit,
        ),
    )(x3, gk, wk, bias_row)
    return out3[..., :cols].reshape(B, Tn, Hn, Wn, Cout)


# ----------------------------------------------------------------------------- #
# Pure-JAX reference (gather + lax.conv) for correctness check
# ----------------------------------------------------------------------------- #
def _reference(x, weight, bias, target_size):
    B, T, H, W, C = x.shape
    Tn, Hn, Wn = target_size
    x_flat = x.reshape(B * T, H, W, C)
    h_idx = (jnp.arange(Hn) * H) // Hn
    w_idx = (jnp.arange(Wn) * W) // Wn
    x_up = x_flat[:, h_idx][:, :, w_idx]
    out = lax.conv_general_dilated(
        x_up.astype(jnp.float32), weight.astype(jnp.float32),
        window_strides=(1, 1), padding="SAME",
        dimension_numbers=("NHWC", "HWIO", "NHWC"),
    ) + bias.astype(jnp.float32)[None, None, None, :]
    return out.reshape(B, Tn, Hn, Wn, weight.shape[-1])


if __name__ == "__main__":
    # Module config: dim=4, out_dim=8, target_size=(4, 16, 16),
    # temporal_upsample=False, kernel_size=3, layout='THWC'
    dim, out_dim = 4, 8
    B, T, H, W = 2, 4, 8, 8
    target_size = (4, 16, 16)

    key = jax.random.PRNGKey(0)
    kx, kw_, kb = jax.random.split(key, 3)
    x = jax.random.normal(kx, (B, T, H, W, dim), dtype=jnp.float32)
    weight = jax.random.normal(kw_, (KSIZE, KSIZE, dim, out_dim), dtype=jnp.float32) * 0.1
    bias = jax.random.normal(kb, (out_dim,), dtype=jnp.float32) * 0.1

    ref = _reference(x, weight, bias, target_size)

    # Primary (fully-folded, single-matmul) path, f32 — tight tolerance.
    out = jax.block_until_ready(upsample3d_layer(x, weight, bias, target_size))
    assert out.shape == (B,) + tuple(target_size) + (out_dim,)
    assert jnp.allclose(out, ref, atol=2e-4, rtol=2e-4), "folded path mismatch"

    # General (tiled) fallback path, forced, f32 — validates the large-config path.
    out_g = jax.block_until_ready(
        upsample3d_layer(x, weight, bias, target_size, force_general=True))
    assert jnp.allclose(out_g, ref, atol=2e-4, rtol=2e-4), "general path mismatch"

    # bf16 MXU-input path (f32 accumulation) — looser tolerance by construction.
    out_bf = jax.block_until_ready(
        upsample3d_layer(x, weight, bias, target_size, compute_dtype=jnp.bfloat16))
    assert jnp.allclose(out_bf, ref, atol=3e-2, rtol=3e-2), "bf16 path mismatch"

    print("KERNEL_OK")
</pallas_src>

<mosaic_0001>
module attributes {stable_mosaic.version = 11 : i64} {
  func.func @_folded_kernel(%arg0: i32, %arg1: memref<8x256xf32, #tpu.memory_space<vmem>>, %arg2: memref<256x2048xf32, #tpu.memory_space<vmem>>, %arg3: memref<1x2048xf32, #tpu.memory_space<vmem>>, %arg4: memref<8x2048xf32, #tpu.memory_space<vmem>>) attributes {dimension_semantics = [#tpu.dimension_semantics<parallel>], iteration_bounds = array<i64: 1>, scalar_prefetch = 0 : i64, scratch_operands = 0 : i64, tpu.core_type = #tpu.core_type<tc>, window_params = [{transform_indices = @transform_0, window_bounds = array<i64: 8, 256>}, {pipeline_mode = #tpu.pipeline_mode<synchronous>, transform_indices = @transform_1, window_bounds = array<i64: 256, 2048>}, {pipeline_mode = #tpu.pipeline_mode<synchronous>, transform_indices = @transform_2, window_bounds = array<i64: 1, 2048>}, {transform_indices = @transform_3, window_bounds = array<i64: 8, 2048>}]} {
    %c0 = arith.constant 0 : index
    %c0_0 = arith.constant 0 : index
    %0 = vector.load %arg1[%c0, %c0_0] : memref<8x256xf32, #tpu.memory_space<vmem>>, vector<8x256xf32>
    %c0_1 = arith.constant 0 : index
    %c0_2 = arith.constant 0 : index
    %1 = vector.load %arg2[%c0_1, %c0_2] : memref<256x2048xf32, #tpu.memory_space<vmem>>, vector<256x2048xf32>
    %cst = arith.constant dense<0.000000e+00> : vector<8x2048xf32>
    %2 = tpu.matmul %0, %1, %cst {dimension_numbers = #tpu.dot_dimension_numbers<[1], [0], [0], [1], [0, 0, 1, 1], [], []>} : vector<8x256xf32>, vector<256x2048xf32>, vector<8x2048xf32> -> vector<8x2048xf32>
    %c0_3 = arith.constant 0 : index
    %c0_4 = arith.constant 0 : index
    %3 = vector.load %arg3[%c0_3, %c0_4] : memref<1x2048xf32, #tpu.memory_space<vmem>>, vector<1x2048xf32>
    %4 = vector.broadcast %3 : vector<1x2048xf32> to vector<8x2048xf32>
    %5 = arith.addf %2, %4 : vector<8x2048xf32>
    %c0_5 = arith.constant 0 : index
    %c0_6 = arith.constant 0 : index
    %6 = vector.load %arg4[%c0_5, %c0_6] : memref<8x2048xf32, #tpu.memory_space<vmem>>, vector<8x2048xf32>
    tpu.vector_store %arg4[%c0_5, %c0_6], %5 {strides = array<i32>} : memref<8x2048xf32, #tpu.memory_space<vmem>>, vector<8x2048xf32>,
    return
  }
  func.func @transform_0(%arg0: i32) -> (i32, i32) {
    %c0_i32 = arith.constant 0 : i32
    %c0_i32_0 = arith.constant 0 : i32
    return %arg0, %c0_i32 : i32, i32
  }
  func.func @transform_1(%arg0: i32) -> (i32, i32) {
    %c0_i32 = arith.constant 0 : i32
    %c0_i32_0 = arith.constant 0 : i32
    %c0_i32_1 = arith.constant 0 : i32
    return %c0_i32, %c0_i32_0 : i32, i32
  }
  func.func @transform_2(%arg0: i32) -> (i32, i32) {
    %c0_i32 = arith.constant 0 : i32
    %c0_i32_0 = arith.constant 0 : i32
    %c0_i32_1 = arith.constant 0 : i32
    return %c0_i32, %c0_i32_0 : i32, i32
  }
  func.func @transform_3(%arg0: i32) -> (i32, i32) {
    %c0_i32 = arith.constant 0 : i32
    %c0_i32_0 = arith.constant 0 : i32
    return %arg0, %c0_i32 : i32, i32
  }
}

</mosaic_0001>

<bundles_post_ra>
// kernel: tpu_custom_call.1
= control target key start
LH: loop header
LB: loop body
LE: loop exit
PB: predicated region body
PF: predicated region fallthrough
CT: control target
= control target key end

     0   :  { %8 = vsyncpa [#allocation3], 0  ;;  %s1442_s0 = inlined_call_operand.hbm [shape: f32[8,256], index: 0, kind: input, shape index: {}]   ;;  %s1443_s1 = inlined_call_operand.hbm [shape: f32[256,2048], index: 1, kind: input, shape index: {}]   ;;  %s1444_s2 = inlined_call_operand.hbm [shape: f32[1,2048], index: 2, kind: input, shape index: {}]   ;;  %s1445_s3 = inlined_call_operand.hbm [shape: f32[8,2048], index: 3, kind: output, shape index: {}]  }
   0x1   :  { %9 = vsyncpa [#allocation6], 0 }
   0x2   :  { %10 = vsyncpa [#allocation4], 0  ;;  %s1344_s12 = smov [#allocation5]  }
   0x3   :  { %s26_s13 = sshll.u32 %s1344_s12, 4  ;;  %s27_s13 = int_to_ptr.vmem [resolvable:$true] %s26_s13 }
   0x4   :  { %s1266_s14 = scalar_lea.vmem %s27_s13, 65536  ;;  %p1271_p1 = scmp.lt.s32.totalorder %s27_s13, %s27_s13 }
   0x5   :  { %p1267_p0 = scmp.ne.s32.totalorder %s27_s13, %s1266_s14  ;;  %p1272_p2 = scmp.lt.s32.totalorder %s1266_s14, %s1266_s14 }
   0x7   :  { %p1273_p3 = por %p1272_p2, %p1271_p1 }
   0x9   :  { %p1274_p4 = pnand %p1273_p3, %p1267_p0 }
   0xb   :  { %1277 = shalt.err (!%p1274_p4)
}
   0xc   :  { %s1345_s15 = smov 2048   ;;  %s1346_s16 = smov 128  }
   0xd   :  { %32 = dma.hbm_to_vmem [thread:$0]  %s1443_s1, 65536, %s27_s13, [#allocation6], %s1345_s15, %s1345_s15, %s1346_s16  }
   0xe   :  { %s1347_s19 = smov [#allocation2]   ;;  %s1348_s21 = smov [#allocation7]  }
   0xf   :  { %s17_s20 = sshll.u32 %s1347_s19, 4  ;;  %s39_s22 = sshll.u32 %s1348_s21, 4  ;;  %s18_s20 = int_to_ptr.vmem [resolvable:$true] %s17_s20  ;;  %s40_s22 = int_to_ptr.vmem [resolvable:$true] %s39_s22 }
  0x10   :  { %s1286_s23 = scalar_lea.vmem %s18_s20, 256  ;;  %p1291_p6 = scmp.lt.s32.totalorder %s18_s20, %s18_s20 }
  0x11   :  { %p1287_p5 = scmp.ne.s32.totalorder %s18_s20, %s1286_s23  ;;  %p1292_p7 = scmp.lt.s32.totalorder %s1286_s23, %s1286_s23 }
  0x13   :  { %p1293_p8 = por %p1292_p7, %p1291_p6 }
  0x15   :  { %p1294_p9 = pnand %p1293_p8, %p1287_p5 }
  0x17   :  { %1297 = shalt.err (!%p1294_p9)
}
  0x18   :  { %20 = dma.hbm_to_vmem [thread:$0]  %s1442_s0, 256, %s18_s20, [#allocation3]  }
  0x19   :  { %s1306_s26 = scalar_lea.vmem %s40_s22, 256  ;;  %p1311_p11 = scmp.lt.s32.totalorder %s40_s22, %s40_s22 }
  0x1a   :  { %p1307_p10 = scmp.ne.s32.totalorder %s40_s22, %s1306_s26  ;;  %p1312_p12 = scmp.lt.s32.totalorder %s1306_s26, %s1306_s26 }
  0x1c   :  { %p1313_p13 = por %p1312_p12, %p1311_p11 }
  0x1e   :  { %p1314_p0 = pnand %p1313_p13, %p1307_p10 }
  0x20   :  { %1317 = shalt.err (!%p1314_p0)
}
  0x21   :  { %42 = dma.hbm_to_vmem [thread:$0]  %s1444_s2, 256, %s40_s22, [#allocation6]  }
  0x22   :  { %1338 = dma.done.wait [#allocation3], 256  }
  0x23   :  { %1339 = vsyncadd [#allocation3], 4294967040 }
  0x24   :  { %1340 = dma.done.wait [#allocation6], 65792  }
  0x25   :  { %1341 = vsyncadd [#allocation6], 4294901504  ;;  %v295_v0 = vld [vmem:[#allocation5 + $0x788] sm:$0xff]  ;;  %v297_v1 = vld [vmem:[#allocation5 + $0x798] sm:$0xff]  ;;  %s1349_s0 = smov [#allocation8]  }
  0x26   :  { %v294_v2 = vld [vmem:[#allocation5 + $0x780] sm:$0xff]  ;;  %650 = vmatprep.subr.mxu0 %v295_v0  ;;  %721 = vmatprep.subr.mxu1 %v297_v1  ;;  %v296_v3 = vld [vmem:[#allocation5 + $0x790] sm:$0xff]  ;;  %v279_v4 = vld [vmem:[#allocation5 + $0x708] sm:$0xff]  ;;  %s1240_s2 = sshll.u32 %s1349_s0, 4  ;;  %s1241_s2 = int_to_ptr.vmem [resolvable:$true] %s1240_s2 }
  0x27   :  { %v281_v5 = vld [vmem:[#allocation5 + $0x718] sm:$0xff]  ;;  %651 = vmatpush1.msra.mxu0 %v294_v2  ;;  %722 = vmatpush1.msra.mxu1 %v296_v3  ;;  %v278_v6 = vld [vmem:[#allocation5 + $0x700] sm:$0xff]  ;;  %v280_v7 = vld [vmem:[#allocation5 + $0x710] sm:$0xff]  ;;  %s1318_s28 = scalar_lea.vmem %s1241_s2, 2048  ;;  %p1323_p2 = scmp.lt.s32.totalorder %s1241_s2, %s1241_s2 }
  0x28   :  { %v263_v8 = vld [vmem:[#allocation5 + $0x688] sm:$0xff]  ;;  %652 = vmatprep.subr.mxu0 %v279_v4  ;;  %723 = vmatprep.subr.mxu1 %v281_v5  ;;  %v265_v9 = vld [vmem:[#allocation5 + $0x698] sm:$0xff]  ;;  %v262_v10 = vld [vmem:[#allocation5 + $0x680] sm:$0xff]  ;;  %p1319_p1 = scmp.ne.s32.totalorder %s1241_s2, %s1318_s28  ;;  %p1324_p3 = scmp.lt.s32.totalorder %s1318_s28, %s1318_s28 }
  0x29   :  { %v264_v11 = vld [vmem:[#allocation5 + $0x690] sm:$0xff]  ;;  %653 = vmatpush1.msra.mxu0 %v278_v6  ;;  %724 = vmatpush1.msra.mxu1 %v280_v7  ;;  %v247_v12 = vld [vmem:[#allocation5 + $0x608] sm:$0xff]  ;;  %v249_v13 = vld [vmem:[#allocation5 + $0x618] sm:$0xff] }
  0x2a   :  { %654 = vmatprep.subr.mxu0 %v263_v8  ;;  %725 = vmatprep.subr.mxu1 %v265_v9  ;;  %v246_v14 = vld [vmem:[#allocation5 + $0x600] sm:$0xff]  ;;  %v248_v15 = vld [vmem:[#allocation5 + $0x610] sm:$0xff]  ;;  %v231_v16 = vld [vmem:[#allocation5 + $0x588] sm:$0xff]  ;;  %p1325_p4 = por %p1324_p3, %p1323_p2 }
  0x2b   :  { %655 = vmatpush1.msra.mxu0 %v262_v10  ;;  %726 = vmatpush1.msra.mxu1 %v264_v11  ;;  %v233_v17 = vld [vmem:[#allocation5 + $0x598] sm:$0xff]  ;;  %v230_v18 = vld [vmem:[#allocation5 + $0x580] sm:$0xff]  ;;  %v232_v19 = vld [vmem:[#allocation5 + $0x590] sm:$0xff] }
  0x2c   :  { %656 = vmatprep.subr.mxu0 %v247_v12  ;;  %727 = vmatprep.subr.mxu1 %v249_v13  ;;  %v215_v20 = vld [vmem:[#allocation5 + $0x508] sm:$0xff]  ;;  %v217_v21 = vld [vmem:[#allocation5 + $0x518] sm:$0xff]  ;;  %v214_v22 = vld [vmem:[#allocation5 + $0x500] sm:$0xff]  ;;  %p1326_p5 = pnand %p1325_p4, %p1319_p1 }
  0x2d   :  { %657 = vmatpush1.msra.mxu0 %v246_v14  ;;  %728 = vmatpush1.msra.mxu1 %v248_v15  ;;  %v216_v23 = vld [vmem:[#allocation5 + $0x510] sm:$0xff]  ;;  %v199_v24 = vld [vmem:[#allocation5 + $0x488] sm:$0xff]  ;;  %v201_v25 = vld [vmem:[#allocation5 + $0x498] sm:$0xff] }
  0x2e   :  { %658 = vmatprep.subr.mxu0 %v231_v16  ;;  %729 = vmatprep.subr.mxu1 %v233_v17  ;;  %v198_v26 = vld [vmem:[#allocation5 + $0x480] sm:$0xff]  ;;  %v200_v27 = vld [vmem:[#allocation5 + $0x490] sm:$0xff]  ;;  %v183_v28 = vld [vmem:[#allocation5 + $0x408] sm:$0xff] }
  0x2f   :  { %659 = vmatpush1.msra.mxu0 %v230_v18  ;;  %730 = vmatpush1.msra.mxu1 %v232_v19  ;;  %v185_v29 = vld [vmem:[#allocation5 + $0x418] sm:$0xff]  ;;  %v182_v30 = vld [vmem:[#allocation5 + $0x400] sm:$0xff]  ;;  %v184_v31 = vld [vmem:[#allocation5 + $0x410] sm:$0xff] }
  0x30   :  { %660 = vmatprep.subr.mxu0 %v215_v20  ;;  %731 = vmatprep.subr.mxu1 %v217_v21  ;;  %v167_v32 = vld [vmem:[#allocation5 + $0x388] sm:$0xff]  ;;  %v169_v33 = vld [vmem:[#allocation5 + $0x398] sm:$0xff]  ;;  %v166_v34 = vld [vmem:[#allocation5 + $0x380] sm:$0xff] }
  0x31   :  { %661 = vmatpush1.msra.mxu0 %v214_v22  ;;  %732 = vmatpush1.msra.mxu1 %v216_v23  ;;  %v168_v35 = vld [vmem:[#allocation5 + $0x390] sm:$0xff]  ;;  %v151_v36 = vld [vmem:[#allocation5 + $0x308] sm:$0xff]  ;;  %v153_v37 = vld [vmem:[#allocation5 + $0x318] sm:$0xff] }
  0x32   :  { %662 = vmatprep.subr.mxu0 %v199_v24  ;;  %733 = vmatprep.subr.mxu1 %v201_v25  ;;  %v150_v38 = vld [vmem:[#allocation5 + $0x300] sm:$0xff]  ;;  %v152_v39 = vld [vmem:[#allocation5 + $0x310] sm:$0xff]  ;;  %v135_v40 = vld [vmem:[#allocation5 + $0x288] sm:$0xff] }
  0x33   :  { %663 = vmatpush1.msra.mxu0 %v198_v26  ;;  %734 = vmatpush1.msra.mxu1 %v200_v27  ;;  %v137_v41 = vld [vmem:[#allocation5 + $0x298] sm:$0xff]  ;;  %v134_v42 = vld [vmem:[#allocation5 + $0x280] sm:$0xff]  ;;  %v136_v43 = vld [vmem:[#allocation5 + $0x290] sm:$0xff] }
  0x34   :  { %664 = vmatprep.subr.mxu0 %v183_v28  ;;  %735 = vmatprep.subr.mxu1 %v185_v29  ;;  %v119_v44 = vld [vmem:[#allocation5 + $0x208] sm:$0xff]  ;;  %v121_v45 = vld [vmem:[#allocation5 + $0x218] sm:$0xff]  ;;  %v118_v46 = vld [vmem:[#allocation5 + $0x200] sm:$0xff] }
  0x35   :  { %665 = vmatpush1.msra.mxu0 %v182_v30  ;;  %736 = vmatpush1.msra.mxu1 %v184_v31  ;;  %v120_v47 = vld [vmem:[#allocation5 + $0x210] sm:$0xff]  ;;  %v103_v48 = vld [vmem:[#allocation5 + $0x188] sm:$0xff]  ;;  %v105_v49 = vld [vmem:[#allocation5 + $0x198] sm:$0xff] }
  0x36   :  { %666 = vmatprep.subr.mxu0 %v167_v32  ;;  %737 = vmatprep.subr.mxu1 %v169_v33  ;;  %v102_v50 = vld [vmem:[#allocation5 + $0x180] sm:$0xff]  ;;  %v104_v51 = vld [vmem:[#allocation5 + $0x190] sm:$0xff]  ;;  %v87_v52 = vld [vmem:[#allocation5 + $0x108] sm:$0xff] }
  0x37   :  { %667 = vmatpush1.msra.mxu0 %v166_v34  ;;  %738 = vmatpush1.msra.mxu1 %v168_v35  ;;  %v89_v53 = vld [vmem:[#allocation5 + $0x118] sm:$0xff]  ;;  %v86_v54 = vld [vmem:[#allocation5 + $0x100] sm:$0xff]  ;;  %v88_v55 = vld [vmem:[#allocation5 + $0x110] sm:$0xff] }
  0x38   :  { %668 = vmatprep.subr.mxu0 %v151_v36  ;;  %739 = vmatprep.subr.mxu1 %v153_v37  ;;  %v71_v56 = vld [vmem:[#allocation5 + $0x88] sm:$0xff]  ;;  %v73_v57 = vld [vmem:[#allocation5 + $0x98] sm:$0xff]  ;;  %v70_v58 = vld [vmem:[#allocation5 + $0x80] sm:$0xff] }
  0x39   :  { %669 = vmatpush1.msra.mxu0 %v150_v38  ;;  %740 = vmatpush1.msra.mxu1 %v152_v39  ;;  %v72_v59 = vld [vmem:[#allocation5 + $0x90] sm:$0xff]  ;;  %v55_v60 = vld [vmem:[#allocation5 + $0x8] sm:$0xff]  ;;  %v57_v61 = vld [vmem:[#allocation5 + $0x18] sm:$0xff] }
  0x3a   :  { %670 = vmatprep.subr.mxu0 %v135_v40  ;;  %741 = vmatprep.subr.mxu1 %v137_v41  ;;  %v54_v62 = vld [vmem:[#allocation5] sm:$0xff]  ;;  %v56_v63 = vld [vmem:[#allocation5 + $0x10] sm:$0xff]  ;;  %v551_v0 = vld [vmem:[#allocation5 + $0xf88] sm:$0xff] }
  0x3b   :  { %671 = vmatpush1.msra.mxu0 %v134_v42  ;;  %742 = vmatpush1.msra.mxu1 %v136_v43  ;;  %v553_v1 = vld [vmem:[#allocation5 + $0xf98] sm:$0xff]  ;;  %v550_v2 = vld [vmem:[#allocation5 + $0xf80] sm:$0xff]  ;;  %v552_v3 = vld [vmem:[#allocation5 + $0xf90] sm:$0xff] }
  0x3c   :  { %672 = vmatprep.subr.mxu0 %v119_v44  ;;  %743 = vmatprep.subr.mxu1 %v121_v45  ;;  %v535_v4 = vld [vmem:[#allocation5 + $0xf08] sm:$0xff]  ;;  %v537_v5 = vld [vmem:[#allocation5 + $0xf18] sm:$0xff]  ;;  %v534_v6 = vld [vmem:[#allocation5 + $0xf00] sm:$0xff] }
  0x3d   :  { %673 = vmatpush1.msra.mxu0 %v118_v46  ;;  %744 = vmatpush1.msra.mxu1 %v120_v47  ;;  %v536_v7 = vld [vmem:[#allocation5 + $0xf10] sm:$0xff]  ;;  %v519_v8 = vld [vmem:[#allocation5 + $0xe88] sm:$0xff]  ;;  %v521_v9 = vld [vmem:[#allocation5 + $0xe98] sm:$0xff] }
  0x3e   :  { %674 = vmatprep.subr.mxu0 %v103_v48  ;;  %745 = vmatprep.subr.mxu1 %v105_v49  ;;  %v518_v10 = vld [vmem:[#allocation5 + $0xe80] sm:$0xff]  ;;  %v520_v11 = vld [vmem:[#allocation5 + $0xe90] sm:$0xff]  ;;  %v503_v12 = vld [vmem:[#allocation5 + $0xe08] sm:$0xff] }
  0x3f   :  { %675 = vmatpush1.msra.mxu0 %v102_v50  ;;  %746 = vmatpush1.msra.mxu1 %v104_v51  ;;  %v505_v13 = vld [vmem:[#allocation5 + $0xe18] sm:$0xff]  ;;  %v502_v14 = vld [vmem:[#allocation5 + $0xe00] sm:$0xff]  ;;  %v504_v15 = vld [vmem:[#allocation5 + $0xe10] sm:$0xff] }
  0x40   :  { %676 = vmatprep.subr.mxu0 %v87_v52  ;;  %747 = vmatprep.subr.mxu1 %v89_v53  ;;  %v487_v16 = vld [vmem:[#allocation5 + $0xd88] sm:$0xff]  ;;  %v489_v17 = vld [vmem:[#allocation5 + $0xd98] sm:$0xff]  ;;  %v486_v18 = vld [vmem:[#allocation5 + $0xd80] sm:$0xff] }
  0x41   :  { %677 = vmatpush1.msra.mxu0 %v86_v54  ;;  %748 = vmatpush1.msra.mxu1 %v88_v55  ;;  %v488_v19 = vld [vmem:[#allocation5 + $0xd90] sm:$0xff]  ;;  %v471_v20 = vld [vmem:[#allocation5 + $0xd08] sm:$0xff]  ;;  %v473_v21 = vld [vmem:[#allocation5 + $0xd18] sm:$0xff] }
  0x42   :  { %678 = vmatprep.subr.mxu0 %v71_v56  ;;  %749 = vmatprep.subr.mxu1 %v73_v57  ;;  %v470_v22 = vld [vmem:[#allocation5 + $0xd00] sm:$0xff]  ;;  %v472_v23 = vld [vmem:[#allocation5 + $0xd10] sm:$0xff]  ;;  %v455_v24 = vld [vmem:[#allocation5 + $0xc88] sm:$0xff] }
  0x43   :  { %679 = vmatpush1.msra.mxu0 %v70_v58  ;;  %750 = vmatpush1.msra.mxu1 %v72_v59  ;;  %v457_v25 = vld [vmem:[#allocation5 + $0xc98] sm:$0xff]  ;;  %v454_v26 = vld [vmem:[#allocation5 + $0xc80] sm:$0xff]  ;;  %v456_v27 = vld [vmem:[#allocation5 + $0xc90] sm:$0xff] }
  0x44   :  { %680 = vmatprep.subr.mxu0 %v55_v60  ;;  %751 = vmatprep.subr.mxu1 %v57_v61  ;;  %v439_v28 = vld [vmem:[#allocation5 + $0xc08] sm:$0xff]  ;;  %v441_v29 = vld [vmem:[#allocation5 + $0xc18] sm:$0xff]  ;;  %v438_v30 = vld [vmem:[#allocation5 + $0xc00] sm:$0xff] }
  0x45   :  { %681 = vmatpush1.msra.mxu0 %v54_v62  ;;  %752 = vmatpush1.msra.mxu1 %v56_v63  ;;  %v440_v31 = vld [vmem:[#allocation5 + $0xc10] sm:$0xff]  ;;  %v423_v32 = vld [vmem:[#allocation5 + $0xb88] sm:$0xff]  ;;  %v425_v33 = vld [vmem:[#allocation5 + $0xb98] sm:$0xff] }
  0x46   :  { %682 = vmatprep.subr.mxu0 %v551_v0  ;;  %753 = vmatprep.subr.mxu1 %v553_v1  ;;  %v422_v34 = vld [vmem:[#allocation5 + $0xb80] sm:$0xff]  ;;  %v424_v35 = vld [vmem:[#allocation5 + $0xb90] sm:$0xff]  ;;  %v407_v36 = vld [vmem:[#allocation5 + $0xb08] sm:$0xff] }
  0x47   :  { %683 = vmatpush2.msra.mxu0 %v550_v2  ;;  %754 = vmatpush2.msra.mxu1 %v552_v3  ;;  %v409_v37 = vld [vmem:[#allocation5 + $0xb18] sm:$0xff]  ;;  %v406_v38 = vld [vmem:[#allocation5 + $0xb00] sm:$0xff]  ;;  %v408_v39 = vld [vmem:[#allocation5 + $0xb10] sm:$0xff] }
  0x48   :  { %684 = vmatprep.subr.mxu0 %v535_v4  ;;  %755 = vmatprep.subr.mxu1 %v537_v5  ;;  %v391_v40 = vld [vmem:[#allocation5 + $0xa88] sm:$0xff]  ;;  %v393_v41 = vld [vmem:[#allocation5 + $0xa98] sm:$0xff]  ;;  %v390_v42 = vld [vmem:[#allocation5 + $0xa80] sm:$0xff] }
  0x49   :  { %685 = vmatpush2.msra.mxu0 %v534_v6  ;;  %756 = vmatpush2.msra.mxu1 %v536_v7  ;;  %v392_v43 = vld [vmem:[#allocation5 + $0xa90] sm:$0xff]  ;;  %v375_v44 = vld [vmem:[#allocation5 + $0xa08] sm:$0xff]  ;;  %v377_v45 = vld [vmem:[#allocation5 + $0xa18] sm:$0xff] }
  0x4a   :  { %686 = vmatprep.subr.mxu0 %v519_v8  ;;  %757 = vmatprep.subr.mxu1 %v521_v9  ;;  %v374_v46 = vld [vmem:[#allocation5 + $0xa00] sm:$0xff]  ;;  %v376_v47 = vld [vmem:[#allocation5 + $0xa10] sm:$0xff]  ;;  %v359_v48 = vld [vmem:[#allocation5 + $0x988] sm:$0xff] }
  0x4b   :  { %687 = vmatpush2.msra.mxu0 %v518_v10  ;;  %758 = vmatpush2.msra.mxu1 %v520_v11  ;;  %v361_v49 = vld [vmem:[#allocation5 + $0x998] sm:$0xff]  ;;  %v358_v50 = vld [vmem:[#allocation5 + $0x980] sm:$0xff]  ;;  %v360_v51 = vld [vmem:[#allocation5 + $0x990] sm:$0xff] }
  0x4c   :  { %688 = vmatprep.subr.mxu0 %v503_v12  ;;  %759 = vmatprep.subr.mxu1 %v505_v13  ;;  %v343_v52 = vld [vmem:[#allocation5 + $0x908] sm:$0xff]  ;;  %v345_v53 = vld [vmem:[#allocation5 + $0x918] sm:$0xff]  ;;  %v342_v54 = vld [vmem:[#allocation5 + $0x900] sm:$0xff] }
  0x4d   :  { %689 = vmatpush2.msra.mxu0 %v502_v14  ;;  %760 = vmatpush2.msra.mxu1 %v504_v15  ;;  %v344_v55 = vld [vmem:[#allocation5 + $0x910] sm:$0xff]  ;;  %v327_v56 = vld [vmem:[#allocation5 + $0x888] sm:$0xff]  ;;  %v329_v57 = vld [vmem:[#allocation5 + $0x898] sm:$0xff] }
  0x4e   :  { %690 = vmatprep.subr.mxu0 %v487_v16  ;;  %761 = vmatprep.subr.mxu1 %v489_v17  ;;  %v326_v58 = vld [vmem:[#allocation5 + $0x880] sm:$0xff]  ;;  %v328_v59 = vld [vmem:[#allocation5 + $0x890] sm:$0xff]  ;;  %v311_v60 = vld [vmem:[#allocation5 + $0x808] sm:$0xff] }
  0x4f   :  { %691 = vmatpush2.msra.mxu0 %v486_v18  ;;  %762 = vmatpush2.msra.mxu1 %v488_v19  ;;  %v313_v61 = vld [vmem:[#allocation5 + $0x818] sm:$0xff]  ;;  %v310_v62 = vld [vmem:[#allocation5 + $0x800] sm:$0xff]  ;;  %v312_v0 = vld [vmem:[#allocation5 + $0x810] sm:$0xff] }
  0x50   :  { %692 = vmatprep.subr.mxu0 %v471_v20  ;;  %763 = vmatprep.subr.mxu1 %v473_v21  ;;  %v1379_v63 = vld [vmem:[#allocation2 + $0x8] sm:$0xff]  ;;  %v1381_v1 = vld [vmem:[#allocation2] sm:$0xff]  ;;  %v299_v2 = vld [vmem:[#allocation5 + $0x7a8] sm:$0xff] }
  0x51   :  { %693 = vmatpush2.msra.mxu0 %v470_v22  ;;  %764 = vmatpush2.msra.mxu1 %v472_v23  ;;  %v301_v3 = vld [vmem:[#allocation5 + $0x7b8] sm:$0xff]  ;;  %v298_v4 = vld [vmem:[#allocation5 + $0x7a0] sm:$0xff]  ;;  %v300_v5 = vld [vmem:[#allocation5 + $0x7b0] sm:$0xff] }
  0x52   :  { %694 = vmatprep.subr.mxu0 %v455_v24  ;;  %765 = vmatprep.subr.mxu1 %v457_v25  ;;  %v283_v6 = vld [vmem:[#allocation5 + $0x728] sm:$0xff]  ;;  %v285_v7 = vld [vmem:[#allocation5 + $0x738] sm:$0xff]  ;;  %v282_v8 = vld [vmem:[#allocation5 + $0x720] sm:$0xff] }
  0x53   :  { %695 = vmatpush2.msra.mxu0 %v454_v26  ;;  %766 = vmatpush2.msra.mxu1 %v456_v27  ;;  %v284_v9 = vld [vmem:[#allocation5 + $0x730] sm:$0xff]  ;;  %v267_v10 = vld [vmem:[#allocation5 + $0x6a8] sm:$0xff]  ;;  %v269_v11 = vld [vmem:[#allocation5 + $0x6b8] sm:$0xff] }
  0x54   :  { %696 = vmatprep.subr.mxu0 %v439_v28  ;;  %767 = vmatprep.subr.mxu1 %v441_v29  ;;  %v266_v12 = vld [vmem:[#allocation5 + $0x6a0] sm:$0xff]  ;;  %v268_v13 = vld [vmem:[#allocation5 + $0x6b0] sm:$0xff]  ;;  %v251_v14 = vld [vmem:[#allocation5 + $0x628] sm:$0xff] }
  0x55   :  { %697 = vmatpush2.msra.mxu0 %v438_v30  ;;  %768 = vmatpush2.msra.mxu1 %v440_v31  ;;  %v253_v15 = vld [vmem:[#allocation5 + $0x638] sm:$0xff]  ;;  %v250_v16 = vld [vmem:[#allocation5 + $0x620] sm:$0xff]  ;;  %v252_v17 = vld [vmem:[#allocation5 + $0x630] sm:$0xff] }
  0x56   :  { %698 = vmatprep.subr.mxu0 %v423_v32  ;;  %769 = vmatprep.subr.mxu1 %v425_v33  ;;  %v235_v18 = vld [vmem:[#allocation5 + $0x5a8] sm:$0xff]  ;;  %v237_v19 = vld [vmem:[#allocation5 + $0x5b8] sm:$0xff]  ;;  %v234_v20 = vld [vmem:[#allocation5 + $0x5a0] sm:$0xff] }
  0x57   :  { %699 = vmatpush2.msra.mxu0 %v422_v34  ;;  %770 = vmatpush2.msra.mxu1 %v424_v35  ;;  %v236_v21 = vld [vmem:[#allocation5 + $0x5b0] sm:$0xff]  ;;  %v219_v22 = vld [vmem:[#allocation5 + $0x528] sm:$0xff]  ;;  %v221_v23 = vld [vmem:[#allocation5 + $0x538] sm:$0xff] }
  0x58   :  { %700 = vmatprep.subr.mxu0 %v407_v36  ;;  %771 = vmatprep.subr.mxu1 %v409_v37  ;;  %v218_v24 = vld [vmem:[#allocation5 + $0x520] sm:$0xff]  ;;  %v220_v25 = vld [vmem:[#allocation5 + $0x530] sm:$0xff]  ;;  %v203_v26 = vld [vmem:[#allocation5 + $0x4a8] sm:$0xff] }
  0x59   :  { %701 = vmatpush2.msra.mxu0 %v406_v38  ;;  %772 = vmatpush2.msra.mxu1 %v408_v39  ;;  %v205_v27 = vld [vmem:[#allocation5 + $0x4b8] sm:$0xff]  ;;  %v202_v28 = vld [vmem:[#allocation5 + $0x4a0] sm:$0xff]  ;;  %v204_v29 = vld [vmem:[#allocation5 + $0x4b0] sm:$0xff] }
  0x5a   :  { %702 = vmatprep.subr.mxu0 %v391_v40  ;;  %773 = vmatprep.subr.mxu1 %v393_v41  ;;  %v187_v30 = vld [vmem:[#allocation5 + $0x428] sm:$0xff]  ;;  %v189_v31 = vld [vmem:[#allocation5 + $0x438] sm:$0xff]  ;;  %v186_v32 = vld [vmem:[#allocation5 + $0x420] sm:$0xff] }
  0x5b   :  { %703 = vmatpush2.msra.mxu0 %v390_v42  ;;  %774 = vmatpush2.msra.mxu1 %v392_v43  ;;  %v188_v33 = vld [vmem:[#allocation5 + $0x430] sm:$0xff]  ;;  %v171_v34 = vld [vmem:[#allocation5 + $0x3a8] sm:$0xff]  ;;  %v173_v35 = vld [vmem:[#allocation5 + $0x3b8] sm:$0xff] }
  0x5c   :  { %704 = vmatprep.subr.mxu0 %v375_v44  ;;  %775 = vmatprep.subr.mxu1 %v377_v45  ;;  %v170_v36 = vld [vmem:[#allocation5 + $0x3a0] sm:$0xff]  ;;  %v172_v37 = vld [vmem:[#allocation5 + $0x3b0] sm:$0xff]  ;;  %v155_v38 = vld [vmem:[#allocation5 + $0x328] sm:$0xff] }
  0x5d   :  { %705 = vmatpush2.msra.mxu0 %v374_v46  ;;  %776 = vmatpush2.msra.mxu1 %v376_v47  ;;  %v157_v39 = vld [vmem:[#allocation5 + $0x338] sm:$0xff]  ;;  %v154_v40 = vld [vmem:[#allocation5 + $0x320] sm:$0xff]  ;;  %v156_v41 = vld [vmem:[#allocation5 + $0x330] sm:$0xff] }
  0x5e   :  { %706 = vmatprep.subr.mxu0 %v359_v48  ;;  %777 = vmatprep.subr.mxu1 %v361_v49  ;;  %v139_v42 = vld [vmem:[#allocation5 + $0x2a8] sm:$0xff]  ;;  %v141_v43 = vld [vmem:[#allocation5 + $0x2b8] sm:$0xff]  ;;  %v138_v44 = vld [vmem:[#allocation5 + $0x2a0] sm:$0xff] }
  0x5f   :  { %707 = vmatpush2.msra.mxu0 %v358_v50  ;;  %778 = vmatpush2.msra.mxu1 %v360_v51  ;;  %v140_v45 = vld [vmem:[#allocation5 + $0x2b0] sm:$0xff]  ;;  %v123_v46 = vld [vmem:[#allocation5 + $0x228] sm:$0xff]  ;;  %v125_v47 = vld [vmem:[#allocation5 + $0x238] sm:$0xff] }
  0x60   :  { %708 = vmatprep.subr.mxu0 %v343_v52  ;;  %779 = vmatprep.subr.mxu1 %v345_v53  ;;  %v122_v48 = vld [vmem:[#allocation5 + $0x220] sm:$0xff]  ;;  %v124_v49 = vld [vmem:[#allocation5 + $0x230] sm:$0xff]  ;;  %v107_v50 = vld [vmem:[#allocation5 + $0x1a8] sm:$0xff] }
  0x61   :  { %709 = vmatpush2.msra.mxu0 %v342_v54  ;;  %780 = vmatpush2.msra.mxu1 %v344_v55  ;;  %v109_v51 = vld [vmem:[#allocation5 + $0x1b8] sm:$0xff]  ;;  %v106_v52 = vld [vmem:[#allocation5 + $0x1a0] sm:$0xff]  ;;  %v108_v53 = vld [vmem:[#allocation5 + $0x1b0] sm:$0xff] }
  0x62   :  { %710 = vmatprep.subr.mxu0 %v327_v56  ;;  %781 = vmatprep.subr.mxu1 %v329_v57  ;;  %v91_v54 = vld [vmem:[#allocation5 + $0x128] sm:$0xff]  ;;  %v93_v55 = vld [vmem:[#allocation5 + $0x138] sm:$0xff]  ;;  %v90_v56 = vld [vmem:[#allocation5 + $0x120] sm:$0xff] }
  0x63   :  { %711 = vmatpush2.msra.mxu0 %v326_v58  ;;  %782 = vmatpush2.msra.mxu1 %v328_v59  ;;  %v92_v57 = vld [vmem:[#allocation5 + $0x130] sm:$0xff]  ;;  %v75_v58 = vld [vmem:[#allocation5 + $0xa8] sm:$0xff]  ;;  %v77_v59 = vld [vmem:[#allocation5 + $0xb8] sm:$0xff] }
  0x64   :  { %712 = vmatprep.subr.mxu0 %v311_v60  ;;  %783 = vmatprep.subr.mxu1 %v313_v61  ;;  %v74_v60 = vld [vmem:[#allocation5 + $0xa0] sm:$0xff]  ;;  %v76_v61 = vld [vmem:[#allocation5 + $0xb0] sm:$0xff] }
  0x65   :  { %713 = vmatpush2.msra.mxu0 %v310_v62  ;;  %714 = vmatprep.mubr.f32.mxu0 %v1379_v63  ;;  %v59_v62 = vld [vmem:[#allocation5 + $0x28] sm:$0xff] }
  0x66   :  { %784 = vmatpush2.msra.mxu1 %v312_v0  ;;  %785 = vmatprep.mubr.f32.mxu1 %v1379_v63  ;;  %v61_v0 = vld [vmem:[#allocation5 + $0x38] sm:$0xff] }
  0x67   :  { %715 = vmatmul.mubr.f32.vlgmr.msra.gmra.mxu0 %v1381_v1  ;;  %786 = vmatmul.mubr.f32.vlgmr.msra.gmra.mxu1 %v1381_v1 }
  0x68   :  { %792 = vmatprep.subr.mxu0 %v299_v2  ;;  %863 = vmatprep.subr.mxu1 %v301_v3  ;;  %v58_v2 = vld [vmem:[#allocation5 + $0x20] sm:$0xff]  ;;  %v60_v3 = vld [vmem:[#allocation5 + $0x30] sm:$0xff] }
  0x69   :  { %793 = vmatpush1.msra.mxu0 %v298_v4  ;;  %864 = vmatpush1.msra.mxu1 %v300_v5  ;;  %v555_v4 = vld [vmem:[#allocation5 + $0xfa8] sm:$0xff]  ;;  %v557_v5 = vld [vmem:[#allocation5 + $0xfb8] sm:$0xff] }
  0x6a   :  { %794 = vmatprep.subr.mxu0 %v283_v6  ;;  %865 = vmatprep.subr.mxu1 %v285_v7  ;;  %v554_v6 = vld [vmem:[#allocation5 + $0xfa0] sm:$0xff]  ;;  %v556_v7 = vld [vmem:[#allocation5 + $0xfb0] sm:$0xff] }
  0x6b   :  { %795 = vmatpush1.msra.mxu0 %v282_v8  ;;  %866 = vmatpush1.msra.mxu1 %v284_v9  ;;  %v539_v8 = vld [vmem:[#allocation5 + $0xf28] sm:$0xff]  ;;  %v541_v9 = vld [vmem:[#allocation5 + $0xf38] sm:$0xff] }
  0x6c   :  { %796 = vmatprep.subr.mxu0 %v267_v10  ;;  %867 = vmatprep.subr.mxu1 %v269_v11  ;;  %v538_v10 = vld [vmem:[#allocation5 + $0xf20] sm:$0xff]  ;;  %v540_v11 = vld [vmem:[#allocation5 + $0xf30] sm:$0xff] }
  0x6d   :  { %797 = vmatpush1.msra.mxu0 %v266_v12  ;;  %868 = vmatpush1.msra.mxu1 %v268_v13  ;;  %v523_v12 = vld [vmem:[#allocation5 + $0xea8] sm:$0xff]  ;;  %v525_v13 = vld [vmem:[#allocation5 + $0xeb8] sm:$0xff] }
  0x6e   :  { %798 = vmatprep.subr.mxu0 %v251_v14  ;;  %869 = vmatprep.subr.mxu1 %v253_v15  ;;  %v522_v14 = vld [vmem:[#allocation5 + $0xea0] sm:$0xff]  ;;  %v524_v15 = vld [vmem:[#allocation5 + $0xeb0] sm:$0xff] }
  0x6f   :  { %799 = vmatpush1.msra.mxu0 %v250_v16  ;;  %870 = vmatpush1.msra.mxu1 %v252_v17  ;;  %v507_v16 = vld [vmem:[#allocation5 + $0xe28] sm:$0xff]  ;;  %v509_v17 = vld [vmem:[#allocation5 + $0xe38] sm:$0xff] }
  0x70   :  { %800 = vmatprep.subr.mxu0 %v235_v18  ;;  %871 = vmatprep.subr.mxu1 %v237_v19  ;;  %v506_v18 = vld [vmem:[#allocation5 + $0xe20] sm:$0xff]  ;;  %v508_v19 = vld [vmem:[#allocation5 + $0xe30] sm:$0xff] }
  0x71   :  { %801 = vmatpush1.msra.mxu0 %v234_v20  ;;  %872 = vmatpush1.msra.mxu1 %v236_v21  ;;  %v491_v20 = vld [vmem:[#allocation5 + $0xda8] sm:$0xff]  ;;  %v493_v21 = vld [vmem:[#allocation5 + $0xdb8] sm:$0xff] }
  0x72   :  { %802 = vmatprep.subr.mxu0 %v219_v22  ;;  %873 = vmatprep.subr.mxu1 %v221_v23  ;;  %v490_v22 = vld [vmem:[#allocation5 + $0xda0] sm:$0xff]  ;;  %v492_v23 = vld [vmem:[#allocation5 + $0xdb0] sm:$0xff] }
  0x73   :  { %803 = vmatpush1.msra.mxu0 %v218_v24  ;;  %874 = vmatpush1.msra.mxu1 %v220_v25  ;;  %v475_v24 = vld [vmem:[#allocation5 + $0xd28] sm:$0xff]  ;;  %v477_v25 = vld [vmem:[#allocation5 + $0xd38] sm:$0xff] }
  0x74   :  { %804 = vmatprep.subr.mxu0 %v203_v26  ;;  %875 = vmatprep.subr.mxu1 %v205_v27  ;;  %v474_v26 = vld [vmem:[#allocation5 + $0xd20] sm:$0xff]  ;;  %v476_v27 = vld [vmem:[#allocation5 + $0xd30] sm:$0xff] }
  0x75   :  { %805 = vmatpush1.msra.mxu0 %v202_v28  ;;  %876 = vmatpush1.msra.mxu1 %v204_v29  ;;  %v459_v28 = vld [vmem:[#allocation5 + $0xca8] sm:$0xff]  ;;  %v461_v29 = vld [vmem:[#allocation5 + $0xcb8] sm:$0xff] }
  0x76   :  { %806 = vmatprep.subr.mxu0 %v187_v30  ;;  %877 = vmatprep.subr.mxu1 %v189_v31  ;;  %v458_v30 = vld [vmem:[#allocation5 + $0xca0] sm:$0xff]  ;;  %v460_v31 = vld [vmem:[#allocation5 + $0xcb0] sm:$0xff] }
  0x77   :  { %807 = vmatpush1.msra.mxu0 %v186_v32  ;;  %878 = vmatpush1.msra.mxu1 %v188_v33  ;;  %v443_v32 = vld [vmem:[#allocation5 + $0xc28] sm:$0xff]  ;;  %v445_v33 = vld [vmem:[#allocation5 + $0xc38] sm:$0xff] }
  0x78   :  { %808 = vmatprep.subr.mxu0 %v171_v34  ;;  %879 = vmatprep.subr.mxu1 %v173_v35  ;;  %v442_v34 = vld [vmem:[#allocation5 + $0xc20] sm:$0xff]  ;;  %v444_v35 = vld [vmem:[#allocation5 + $0xc30] sm:$0xff] }
  0x79   :  { %809 = vmatpush1.msra.mxu0 %v170_v36  ;;  %880 = vmatpush1.msra.mxu1 %v172_v37  ;;  %v427_v36 = vld [vmem:[#allocation5 + $0xba8] sm:$0xff]  ;;  %v429_v37 = vld [vmem:[#allocation5 + $0xbb8] sm:$0xff] }
  0x7a   :  { %810 = vmatprep.subr.mxu0 %v155_v38  ;;  %881 = vmatprep.subr.mxu1 %v157_v39  ;;  %v426_v38 = vld [vmem:[#allocation5 + $0xba0] sm:$0xff]  ;;  %v428_v39 = vld [vmem:[#allocation5 + $0xbb0] sm:$0xff] }
  0x7b   :  { %811 = vmatpush1.msra.mxu0 %v154_v40  ;;  %882 = vmatpush1.msra.mxu1 %v156_v41  ;;  %v411_v40 = vld [vmem:[#allocation5 + $0xb28] sm:$0xff]  ;;  %v413_v41 = vld [vmem:[#allocation5 + $0xb38] sm:$0xff] }
  0x7c   :  { %812 = vmatprep.subr.mxu0 %v139_v42  ;;  %883 = vmatprep.subr.mxu1 %v141_v43  ;;  %v410_v42 = vld [vmem:[#allocation5 + $0xb20] sm:$0xff]  ;;  %v412_v43 = vld [vmem:[#allocation5 + $0xb30] sm:$0xff] }
  0x7d   :  { %813 = vmatpush1.msra.mxu0 %v138_v44  ;;  %884 = vmatpush1.msra.mxu1 %v140_v45  ;;  %v395_v44 = vld [vmem:[#allocation5 + $0xaa8] sm:$0xff]  ;;  %v397_v45 = vld [vmem:[#allocation5 + $0xab8] sm:$0xff] }
  0x7e   :  { %814 = vmatprep.subr.mxu0 %v123_v46  ;;  %885 = vmatprep.subr.mxu1 %v125_v47  ;;  %v394_v46 = vld [vmem:[#allocation5 + $0xaa0] sm:$0xff]  ;;  %v396_v47 = vld [vmem:[#allocation5 + $0xab0] sm:$0xff] }
  0x7f   :  { %815 = vmatpush1.msra.mxu0 %v122_v48  ;;  %886 = vmatpush1.msra.mxu1 %v124_v49  ;;  %v379_v48 = vld [vmem:[#allocation5 + $0xa28] sm:$0xff]  ;;  %v381_v49 = vld [vmem:[#allocation5 + $0xa38] sm:$0xff] }
  0x80   :  { %816 = vmatprep.subr.mxu0 %v107_v50  ;;  %887 = vmatprep.subr.mxu1 %v109_v51  ;;  %v378_v50 = vld [vmem:[#allocation5 + $0xa20] sm:$0xff]  ;;  %v380_v51 = vld [vmem:[#allocation5 + $0xa30] sm:$0xff] }
  0x81   :  { %817 = vmatpush1.msra.mxu0 %v106_v52  ;;  %888 = vmatpush1.msra.mxu1 %v108_v53  ;;  %v363_v52 = vld [vmem:[#allocation5 + $0x9a8] sm:$0xff]  ;;  %v365_v53 = vld [vmem:[#allocation5 + $0x9b8] sm:$0xff] }
  0x82   :  { %818 = vmatprep.subr.mxu0 %v91_v54  ;;  %889 = vmatprep.subr.mxu1 %v93_v55  ;;  %v362_v54 = vld [vmem:[#allocation5 + $0x9a0] sm:$0xff]  ;;  %v364_v55 = vld [vmem:[#allocation5 + $0x9b0] sm:$0xff] }
  0x83   :  { %819 = vmatpush1.msra.mxu0 %v90_v56  ;;  %890 = vmatpush1.msra.mxu1 %v92_v57  ;;  %v347_v56 = vld [vmem:[#allocation5 + $0x928] sm:$0xff]  ;;  %v349_v57 = vld [vmem:[#allocation5 + $0x938] sm:$0xff] }
  0x84   :  { %820 = vmatprep.subr.mxu0 %v75_v58  ;;  %891 = vmatprep.subr.mxu1 %v77_v59  ;;  %v346_v58 = vld [vmem:[#allocation5 + $0x920] sm:$0xff]  ;;  %v348_v59 = vld [vmem:[#allocation5 + $0x930] sm:$0xff] }
  0x85   :  { %821 = vmatpush1.msra.mxu0 %v74_v60  ;;  %892 = vmatpush1.msra.mxu1 %v76_v61  ;;  %v331_v60 = vld [vmem:[#allocation5 + $0x8a8] sm:$0xff]  ;;  %v333_v61 = vld [vmem:[#allocation5 + $0x8b8] sm:$0xff] }
  0x86   :  { %822 = vmatprep.subr.mxu0 %v59_v62  ;;  %893 = vmatprep.subr.mxu1 %v61_v0  ;;  %v330_v62 = vld [vmem:[#allocation5 + $0x8a0] sm:$0xff]  ;;  %v332_v0 = vld [vmem:[#allocation5 + $0x8b0] sm:$0xff] }
  0x87   :  { %823 = vmatpush1.msra.mxu0 %v58_v2  ;;  %894 = vmatpush1.msra.mxu1 %v60_v3  ;;  %v315_v2 = vld [vmem:[#allocation5 + $0x828] sm:$0xff]  ;;  %v317_v3 = vld [vmem:[#allocation5 + $0x838] sm:$0xff] }
  0x88   :  { %824 = vmatprep.subr.mxu0 %v555_v4  ;;  %895 = vmatprep.subr.mxu1 %v557_v5  ;;  %v314_v4 = vld [vmem:[#allocation5 + $0x820] sm:$0xff]  ;;  %v316_v5 = vld [vmem:[#allocation5 + $0x830] sm:$0xff] }
  0x89   :  { %825 = vmatpush2.msra.mxu0 %v554_v6  ;;  %896 = vmatpush2.msra.mxu1 %v556_v7  ;;  %v303_v6 = vld [vmem:[#allocation5 + $0x7c8] sm:$0xff]  ;;  %v305_v7 = vld [vmem:[#allocation5 + $0x7d8] sm:$0xff] }
  0x8a   :  { %826 = vmatprep.subr.mxu0 %v539_v8  ;;  %897 = vmatprep.subr.mxu1 %v541_v9  ;;  %v302_v8 = vld [vmem:[#allocation5 + $0x7c0] sm:$0xff]  ;;  %v304_v9 = vld [vmem:[#allocation5 + $0x7d0] sm:$0xff] }
  0x8b   :  { %827 = vmatpush2.msra.mxu0 %v538_v10  ;;  %898 = vmatpush2.msra.mxu1 %v540_v11  ;;  %v287_v10 = vld [vmem:[#allocation5 + $0x748] sm:$0xff]  ;;  %v289_v11 = vld [vmem:[#allocation5 + $0x758] sm:$0xff] }
  0x8c   :  { %828 = vmatprep.subr.mxu0 %v523_v12  ;;  %899 = vmatprep.subr.mxu1 %v525_v13  ;;  %v286_v12 = vld [vmem:[#allocation5 + $0x740] sm:$0xff]  ;;  %v288_v13 = vld [vmem:[#allocation5 + $0x750] sm:$0xff] }
  0x8d   :  { %829 = vmatpush2.msra.mxu0 %v522_v14  ;;  %900 = vmatpush2.msra.mxu1 %v524_v15  ;;  %v271_v14 = vld [vmem:[#allocation5 + $0x6c8] sm:$0xff]  ;;  %v273_v15 = vld [vmem:[#allocation5 + $0x6d8] sm:$0xff] }
  0x8e   :  { %830 = vmatprep.subr.mxu0 %v507_v16  ;;  %901 = vmatprep.subr.mxu1 %v509_v17  ;;  %v270_v16 = vld [vmem:[#allocation5 + $0x6c0] sm:$0xff]  ;;  %v255_v17 = vld [vmem:[#allocation5 + $0x648] sm:$0xff] }
  0x8f   :  { %831 = vmatpush2.msra.mxu0 %v506_v18  ;;  %902 = vmatpush2.msra.mxu1 %v508_v19  ;;  %v257_v18 = vld [vmem:[#allocation5 + $0x658] sm:$0xff]  ;;  %v256_v19 = vld [vmem:[#allocation5 + $0x650] sm:$0xff] }
  0x90   :  { %832 = vmatprep.subr.mxu0 %v491_v20  ;;  %903 = vmatprep.subr.mxu1 %v493_v21  ;;  %v239_v20 = vld [vmem:[#allocation5 + $0x5c8] sm:$0xff]  ;;  %v241_v21 = vld [vmem:[#allocation5 + $0x5d8] sm:$0xff] }
  0x91   :  { %833 = vmatpush2.msra.mxu0 %v490_v22  ;;  %904 = vmatpush2.msra.mxu1 %v492_v23  ;;  %v238_v22 = vld [vmem:[#allocation5 + $0x5c0] sm:$0xff]  ;;  %v240_v23 = vld [vmem:[#allocation5 + $0x5d0] sm:$0xff] }
  0x92   :  { %834 = vmatprep.subr.mxu0 %v475_v24  ;;  %905 = vmatprep.subr.mxu1 %v477_v25  ;;  %v223_v24 = vld [vmem:[#allocation5 + $0x548] sm:$0xff]  ;;  %v225_v25 = vld [vmem:[#allocation5 + $0x558] sm:$0xff] }
  0x93   :  { %835 = vmatpush2.msra.mxu0 %v474_v26  ;;  %906 = vmatpush2.msra.mxu1 %v476_v27  ;;  %v222_v26 = vld [vmem:[#allocation5 + $0x540] sm:$0xff]  ;;  %v224_v27 = vld [vmem:[#allocation5 + $0x550] sm:$0xff] }
  0x94   :  { %836 = vmatprep.subr.mxu0 %v459_v28  ;;  %907 = vmatprep.subr.mxu1 %v461_v29  ;;  %v207_v28 = vld [vmem:[#allocation5 + $0x4c8] sm:$0xff]  ;;  %v209_v29 = vld [vmem:[#allocation5 + $0x4d8] sm:$0xff] }
  0x95   :  { %837 = vmatpush2.msra.mxu0 %v458_v30  ;;  %908 = vmatpush2.msra.mxu1 %v460_v31  ;;  %v206_v30 = vld [vmem:[#allocation5 + $0x4c0] sm:$0xff]  ;;  %v208_v31 = vld [vmem:[#allocation5 + $0x4d0] sm:$0xff] }
  0x96   :  { %838 = vmatprep.subr.mxu0 %v443_v32  ;;  %909 = vmatprep.subr.mxu1 %v445_v33  ;;  %v191_v32 = vld [vmem:[#allocation5 + $0x448] sm:$0xff]  ;;  %v193_v33 = vld [vmem:[#allocation5 + $0x458] sm:$0xff] }
  0x97   :  { %839 = vmatpush2.msra.mxu0 %v442_v34  ;;  %910 = vmatpush2.msra.mxu1 %v444_v35  ;;  %v190_v34 = vld [vmem:[#allocation5 + $0x440] sm:$0xff]  ;;  %v192_v35 = vld [vmem:[#allocation5 + $0x450] sm:$0xff] }
  0x98   :  { %840 = vmatprep.subr.mxu0 %v427_v36  ;;  %911 = vmatprep.subr.mxu1 %v429_v37  ;;  %v175_v36 = vld [vmem:[#allocation5 + $0x3c8] sm:$0xff]  ;;  %v177_v37 = vld [vmem:[#allocation5 + $0x3d8] sm:$0xff] }
  0x99   :  { %841 = vmatpush2.msra.mxu0 %v426_v38  ;;  %912 = vmatpush2.msra.mxu1 %v428_v39  ;;  %v174_v38 = vld [vmem:[#allocation5 + $0x3c0] sm:$0xff]  ;;  %v176_v39 = vld [vmem:[#allocation5 + $0x3d0] sm:$0xff] }
  0x9a   :  { %842 = vmatprep.subr.mxu0 %v411_v40  ;;  %913 = vmatprep.subr.mxu1 %v413_v41  ;;  %v159_v40 = vld [vmem:[#allocation5 + $0x348] sm:$0xff]  ;;  %v161_v41 = vld [vmem:[#allocation5 + $0x358] sm:$0xff] }
  0x9b   :  { %843 = vmatpush2.msra.mxu0 %v410_v42  ;;  %914 = vmatpush2.msra.mxu1 %v412_v43  ;;  %v158_v42 = vld [vmem:[#allocation5 + $0x340] sm:$0xff]  ;;  %v160_v43 = vld [vmem:[#allocation5 + $0x350] sm:$0xff] }
  0x9c   :  { %844 = vmatprep.subr.mxu0 %v395_v44  ;;  %915 = vmatprep.subr.mxu1 %v397_v45  ;;  %v143_v44 = vld [vmem:[#allocation5 + $0x2c8] sm:$0xff]  ;;  %v145_v45 = vld [vmem:[#allocation5 + $0x2d8] sm:$0xff] }
  0x9d   :  { %845 = vmatpush2.msra.mxu0 %v394_v46  ;;  %916 = vmatpush2.msra.mxu1 %v396_v47  ;;  %v142_v46 = vld [vmem:[#allocation5 + $0x2c0] sm:$0xff]  ;;  %v144_v47 = vld [vmem:[#allocation5 + $0x2d0] sm:$0xff] }
  0x9e   :  { %846 = vmatprep.subr.mxu0 %v379_v48  ;;  %917 = vmatprep.subr.mxu1 %v381_v49  ;;  %v127_v48 = vld [vmem:[#allocation5 + $0x248] sm:$0xff]  ;;  %v129_v49 = vld [vmem:[#allocation5 + $0x258] sm:$0xff] }
  0x9f   :  { %847 = vmatpush2.msra.mxu0 %v378_v50  ;;  %918 = vmatpush2.msra.mxu1 %v380_v51  ;;  %v126_v50 = vld [vmem:[#allocation5 + $0x240] sm:$0xff]  ;;  %v128_v51 = vld [vmem:[#allocation5 + $0x250] sm:$0xff] }
  0xa0   :  { %848 = vmatprep.subr.mxu0 %v363_v52  ;;  %919 = vmatprep.subr.mxu1 %v365_v53  ;;  %v111_v52 = vld [vmem:[#allocation5 + $0x1c8] sm:$0xff]  ;;  %v113_v53 = vld [vmem:[#allocation5 + $0x1d8] sm:$0xff] }
  0xa1   :  { %849 = vmatpush2.msra.mxu0 %v362_v54  ;;  %920 = vmatpush2.msra.mxu1 %v364_v55  ;;  %v110_v54 = vld [vmem:[#allocation5 + $0x1c0] sm:$0xff]  ;;  %v112_v55 = vld [vmem:[#allocation5 + $0x1d0] sm:$0xff] }
  0xa2   :  { %850 = vmatprep.subr.mxu0 %v347_v56  ;;  %921 = vmatprep.subr.mxu1 %v349_v57  ;;  %v95_v56 = vld [vmem:[#allocation5 + $0x148] sm:$0xff]  ;;  %v97_v57 = vld [vmem:[#allocation5 + $0x158] sm:$0xff] }
  0xa3   :  { %851 = vmatpush2.msra.mxu0 %v346_v58  ;;  %922 = vmatpush2.msra.mxu1 %v348_v59  ;;  %v94_v58 = vld [vmem:[#allocation5 + $0x140] sm:$0xff]  ;;  %v96_v59 = vld [vmem:[#allocation5 + $0x150] sm:$0xff] }
  0xa4   :  { %852 = vmatprep.subr.mxu0 %v331_v60  ;;  %923 = vmatprep.subr.mxu1 %v333_v61  ;;  %v79_v60 = vld [vmem:[#allocation5 + $0xc8] sm:$0xff]  ;;  %v81_v61 = vld [vmem:[#allocation5 + $0xd8] sm:$0xff] }
  0xa5   :  { %853 = vmatpush2.msra.mxu0 %v330_v62  ;;  %924 = vmatpush2.msra.mxu1 %v332_v0  ;;  %v78_v62 = vld [vmem:[#allocation5 + $0xc0] sm:$0xff]  ;;  %v80_v0 = vld [vmem:[#allocation5 + $0xd0] sm:$0xff] }
  0xa6   :  { %854 = vmatprep.subr.mxu0 %v315_v2  ;;  %925 = vmatprep.subr.mxu1 %v317_v3  ;;  %v63_v2 = vld [vmem:[#allocation5 + $0x48] sm:$0xff]  ;;  %v65_v3 = vld [vmem:[#allocation5 + $0x58] sm:$0xff] }
  0xa7   :  { %855 = vmatpush2.msra.mxu0 %v314_v4  ;;  %856 = vmatprep.mubr.f32.mxu0 %v1379_v63  ;;  %v62_v4 = vld [vmem:[#allocation5 + $0x40] sm:$0xff] }
  0xa8   :  { %926 = vmatpush2.msra.mxu1 %v316_v5  ;;  %927 = vmatprep.mubr.f32.mxu1 %v1379_v63  ;;  %v272_v63 = vld [vmem:[#allocation5 + $0x6d0] sm:$0xff] }
  0xa9   :  { %857 = vmatmul.mubr.f32.vlgmr.msra.gmra.mxu0 %v1381_v1  ;;  %928 = vmatmul.mubr.f32.vlgmr.msra.gmra.mxu1 %v1381_v1  ;;  %v254_v1 = vld [vmem:[#allocation5 + $0x640] sm:$0xff]  ;;  %v64_v5 = vld [vmem:[#allocation5 + $0x50] sm:$0xff] }
  0xaa   :  { %934 = vmatprep.subr.mxu0 %v303_v6  ;;  %1005 = vmatprep.subr.mxu1 %v305_v7  ;;  %v559_v6 = vld [vmem:[#allocation5 + $0xfc8] sm:$0xff]  ;;  %v561_v7 = vld [vmem:[#allocation5 + $0xfd8] sm:$0xff] }
  0xab   :  { %935 = vmatpush1.msra.mxu0 %v302_v8  ;;  %1006 = vmatpush1.msra.mxu1 %v304_v9  ;;  %v558_v8 = vld [vmem:[#allocation5 + $0xfc0] sm:$0xff]  ;;  %v560_v9 = vld [vmem:[#allocation5 + $0xfd0] sm:$0xff] }
  0xac   :  { %936 = vmatprep.subr.mxu0 %v287_v10  ;;  %1007 = vmatprep.subr.mxu1 %v289_v11  ;;  %v543_v10 = vld [vmem:[#allocation5 + $0xf48] sm:$0xff]  ;;  %v545_v11 = vld [vmem:[#allocation5 + $0xf58] sm:$0xff] }
  0xad   :  { %937 = vmatpush1.msra.mxu0 %v286_v12  ;;  %1008 = vmatpush1.msra.mxu1 %v288_v13  ;;  %v542_v12 = vld [vmem:[#allocation5 + $0xf40] sm:$0xff]  ;;  %v544_v13 = vld [vmem:[#allocation5 + $0xf50] sm:$0xff] }
  0xae   :  { %938 = vmatprep.subr.mxu0 %v271_v14  ;;  %1009 = vmatprep.subr.mxu1 %v273_v15  ;;  %v527_v14 = vld [vmem:[#allocation5 + $0xec8] sm:$0xff]  ;;  %v529_v15 = vld [vmem:[#allocation5 + $0xed8] sm:$0xff] }
  0xaf   :  { %939 = vmatpush1.msra.mxu0 %v270_v16  ;;  %1010 = vmatpush1.msra.mxu1 %v272_v63  ;;  %v526_v16 = vld [vmem:[#allocation5 + $0xec0] sm:$0xff]  ;;  %v528_v63 = vld [vmem:[#allocation5 + $0xed0] sm:$0xff] }
  0xb0   :  { %940 = vmatprep.subr.mxu0 %v255_v17  ;;  %1011 = vmatprep.subr.mxu1 %v257_v18  ;;  %v511_v17 = vld [vmem:[#allocation5 + $0xe48] sm:$0xff]  ;;  %v513_v18 = vld [vmem:[#allocation5 + $0xe58] sm:$0xff] }
  0xb1   :  { %941 = vmatpush1.msra.mxu0 %v254_v1  ;;  %1012 = vmatpush1.msra.mxu1 %v256_v19  ;;  %v510_v1 = vld [vmem:[#allocation5 + $0xe40] sm:$0xff]  ;;  %v512_v19 = vld [vmem:[#allocation5 + $0xe50] sm:$0xff] }
  0xb2   :  { %942 = vmatprep.subr.mxu0 %v239_v20  ;;  %1013 = vmatprep.subr.mxu1 %v241_v21  ;;  %v495_v20 = vld [vmem:[#allocation5 + $0xdc8] sm:$0xff]  ;;  %v497_v21 = vld [vmem:[#allocation5 + $0xdd8] sm:$0xff] }
  0xb3   :  { %943 = vmatpush1.msra.mxu0 %v238_v22  ;;  %1014 = vmatpush1.msra.mxu1 %v240_v23  ;;  %v494_v22 = vld [vmem:[#allocation5 + $0xdc0] sm:$0xff]  ;;  %v496_v23 = vld [vmem:[#allocation5 + $0xdd0] sm:$0xff] }
  0xb4   :  { %944 = vmatprep.subr.mxu0 %v223_v24  ;;  %1015 = vmatprep.subr.mxu1 %v225_v25  ;;  %v479_v24 = vld [vmem:[#allocation5 + $0xd48] sm:$0xff]  ;;  %v481_v25 = vld [vmem:[#allocation5 + $0xd58] sm:$0xff] }
  0xb5   :  { %945 = vmatpush1.msra.mxu0 %v222_v26  ;;  %1016 = vmatpush1.msra.mxu1 %v224_v27  ;;  %v478_v26 = vld [vmem:[#allocation5 + $0xd40] sm:$0xff]  ;;  %v480_v27 = vld [vmem:[#allocation5 + $0xd50] sm:$0xff] }
  0xb6   :  { %946 = vmatprep.subr.mxu0 %v207_v28  ;;  %1017 = vmatprep.subr.mxu1 %v209_v29  ;;  %v463_v28 = vld [vmem:[#allocation5 + $0xcc8] sm:$0xff]  ;;  %v465_v29 = vld [vmem:[#allocation5 + $0xcd8] sm:$0xff] }
  0xb7   :  { %947 = vmatpush1.msra.mxu0 %v206_v30  ;;  %1018 = vmatpush1.msra.mxu1 %v208_v31  ;;  %v462_v30 = vld [vmem:[#allocation5 + $0xcc0] sm:$0xff]  ;;  %v464_v31 = vld [vmem:[#allocation5 + $0xcd0] sm:$0xff] }
  0xb8   :  { %948 = vmatprep.subr.mxu0 %v191_v32  ;;  %1019 = vmatprep.subr.mxu1 %v193_v33  ;;  %v447_v32 = vld [vmem:[#allocation5 + $0xc48] sm:$0xff]  ;;  %v449_v33 = vld [vmem:[#allocation5 + $0xc58] sm:$0xff] }
  0xb9   :  { %949 = vmatpush1.msra.mxu0 %v190_v34  ;;  %1020 = vmatpush1.msra.mxu1 %v192_v35  ;;  %v446_v34 = vld [vmem:[#allocation5 + $0xc40] sm:$0xff]  ;;  %v448_v35 = vld [vmem:[#allocation5 + $0xc50] sm:$0xff] }
  0xba   :  { %950 = vmatprep.subr.mxu0 %v175_v36  ;;  %1021 = vmatprep.subr.mxu1 %v177_v37  ;;  %v431_v36 = vld [vmem:[#allocation5 + $0xbc8] sm:$0xff]  ;;  %v433_v37 = vld [vmem:[#allocation5 + $0xbd8] sm:$0xff] }
  0xbb   :  { %951 = vmatpush1.msra.mxu0 %v174_v38  ;;  %1022 = vmatpush1.msra.mxu1 %v176_v39  ;;  %v430_v38 = vld [vmem:[#allocation5 + $0xbc0] sm:$0xff]  ;;  %v432_v39 = vld [vmem:[#allocation5 + $0xbd0] sm:$0xff] }
  0xbc   :  { %952 = vmatprep.subr.mxu0 %v159_v40  ;;  %1023 = vmatprep.subr.mxu1 %v161_v41  ;;  %v415_v40 = vld [vmem:[#allocation5 + $0xb48] sm:$0xff]  ;;  %v417_v41 = vld [vmem:[#allocation5 + $0xb58] sm:$0xff] }
  0xbd   :  { %953 = vmatpush1.msra.mxu0 %v158_v42  ;;  %1024 = vmatpush1.msra.mxu1 %v160_v43  ;;  %v414_v42 = vld [vmem:[#allocation5 + $0xb40] sm:$0xff]  ;;  %v416_v43 = vld [vmem:[#allocation5 + $0xb50] sm:$0xff] }
  0xbe   :  { %954 = vmatprep.subr.mxu0 %v143_v44  ;;  %1025 = vmatprep.subr.mxu1 %v145_v45  ;;  %v399_v44 = vld [vmem:[#allocation5 + $0xac8] sm:$0xff]  ;;  %v401_v45 = vld [vmem:[#allocation5 + $0xad8] sm:$0xff] }
  0xbf   :  { %955 = vmatpush1.msra.mxu0 %v142_v46  ;;  %1026 = vmatpush1.msra.mxu1 %v144_v47  ;;  %v398_v46 = vld [vmem:[#allocation5 + $0xac0] sm:$0xff]  ;;  %v400_v47 = vld [vmem:[#allocation5 + $0xad0] sm:$0xff] }
  0xc0   :  { %956 = vmatprep.subr.mxu0 %v127_v48  ;;  %1027 = vmatprep.subr.mxu1 %v129_v49  ;;  %v383_v48 = vld [vmem:[#allocation5 + $0xa48] sm:$0xff]  ;;  %v385_v49 = vld [vmem:[#allocation5 + $0xa58] sm:$0xff] }
  0xc1   :  { %957 = vmatpush1.msra.mxu0 %v126_v50  ;;  %1028 = vmatpush1.msra.mxu1 %v128_v51  ;;  %v382_v50 = vld [vmem:[#allocation5 + $0xa40] sm:$0xff]  ;;  %v384_v51 = vld [vmem:[#allocation5 + $0xa50] sm:$0xff] }
  0xc2   :  { %958 = vmatprep.subr.mxu0 %v111_v52  ;;  %1029 = vmatprep.subr.mxu1 %v113_v53  ;;  %v367_v52 = vld [vmem:[#allocation5 + $0x9c8] sm:$0xff]  ;;  %v369_v53 = vld [vmem:[#allocation5 + $0x9d8] sm:$0xff] }
  0xc3   :  { %959 = vmatpush1.msra.mxu0 %v110_v54  ;;  %1030 = vmatpush1.msra.mxu1 %v112_v55  ;;  %v366_v54 = vld [vmem:[#allocation5 + $0x9c0] sm:$0xff]  ;;  %v368_v55 = vld [vmem:[#allocation5 + $0x9d0] sm:$0xff] }
  0xc4   :  { %960 = vmatprep.subr.mxu0 %v95_v56  ;;  %1031 = vmatprep.subr.mxu1 %v97_v57  ;;  %v351_v56 = vld [vmem:[#allocation5 + $0x948] sm:$0xff]  ;;  %v353_v57 = vld [vmem:[#allocation5 + $0x958] sm:$0xff] }
  0xc5   :  { %961 = vmatpush1.msra.mxu0 %v94_v58  ;;  %1032 = vmatpush1.msra.mxu1 %v96_v59  ;;  %v350_v58 = vld [vmem:[#allocation5 + $0x940] sm:$0xff]  ;;  %v352_v59 = vld [vmem:[#allocation5 + $0x950] sm:$0xff] }
  0xc6   :  { %962 = vmatprep.subr.mxu0 %v79_v60  ;;  %1033 = vmatprep.subr.mxu1 %v81_v61  ;;  %v335_v60 = vld [vmem:[#allocation5 + $0x8c8] sm:$0xff]  ;;  %v337_v61 = vld [vmem:[#allocation5 + $0x8d8] sm:$0xff] }
  0xc7   :  { %963 = vmatpush1.msra.mxu0 %v78_v62  ;;  %1034 = vmatpush1.msra.mxu1 %v80_v0  ;;  %v334_v62 = vld [vmem:[#allocation5 + $0x8c0] sm:$0xff]  ;;  %v336_v0 = vld [vmem:[#allocation5 + $0x8d0] sm:$0xff] }
  0xc8   :  { %964 = vmatprep.subr.mxu0 %v63_v2  ;;  %1035 = vmatprep.subr.mxu1 %v65_v3  ;;  %v319_v2 = vld [vmem:[#allocation5 + $0x848] sm:$0xff]  ;;  %v321_v3 = vld [vmem:[#allocation5 + $0x858] sm:$0xff] }
  0xc9   :  { %965 = vmatpush1.msra.mxu0 %v62_v4  ;;  %1036 = vmatpush1.msra.mxu1 %v64_v5  ;;  %v318_v4 = vld [vmem:[#allocation5 + $0x840] sm:$0xff]  ;;  %v320_v5 = vld [vmem:[#allocation5 + $0x850] sm:$0xff] }
  0xca   :  { %966 = vmatprep.subr.mxu0 %v559_v6  ;;  %1037 = vmatprep.subr.mxu1 %v561_v7  ;;  %v1391_v6 = vld [vmem:[#allocation2 + $0x8] sm:$0xff]  ;;  %v307_v7 = vld [vmem:[#allocation5 + $0x7e8] sm:$0xff] }
  0xcb   :  { %967 = vmatpush2.msra.mxu0 %v558_v8  ;;  %1038 = vmatpush2.msra.mxu1 %v560_v9  ;;  %v309_v8 = vld [vmem:[#allocation5 + $0x7f8] sm:$0xff]  ;;  %v306_v9 = vld [vmem:[#allocation5 + $0x7e0] sm:$0xff] }
  0xcc   :  { %968 = vmatprep.subr.mxu0 %v543_v10  ;;  %1039 = vmatprep.subr.mxu1 %v545_v11  ;;  %v308_v10 = vld [vmem:[#allocation5 + $0x7f0] sm:$0xff] }
  0xcd   :  { %969 = vmatpush2.msra.mxu0 %v542_v12  ;;  %1040 = vmatpush2.msra.mxu1 %v544_v13  ;;  %v1395_v11 = vld [vmem:[#allocation2] sm:$0xff]  ;;  %v291_v12 = vld [vmem:[#allocation5 + $0x768] sm:$0xff]  ;;  %v293_v13 = vld [vmem:[#allocation5 + $0x778] sm:$0xff] }
  0xce   :  { %970 = vmatprep.subr.mxu0 %v527_v14  ;;  %1041 = vmatprep.subr.mxu1 %v529_v15  ;;  %v290_v14 = vld [vmem:[#allocation5 + $0x760] sm:$0xff]  ;;  %v292_v15 = vld [vmem:[#allocation5 + $0x770] sm:$0xff] }
  0xcf   :  { %971 = vmatpush2.msra.mxu0 %v526_v16  ;;  %1042 = vmatpush2.msra.mxu1 %v528_v63  ;;  %v275_v16 = vld [vmem:[#allocation5 + $0x6e8] sm:$0xff]  ;;  %v277_v63 = vld [vmem:[#allocation5 + $0x6f8] sm:$0xff] }
  0xd0   :  { %972 = vmatprep.subr.mxu0 %v511_v17  ;;  %1043 = vmatprep.subr.mxu1 %v513_v18  ;;  %v274_v17 = vld [vmem:[#allocation5 + $0x6e0] sm:$0xff]  ;;  %v276_v18 = vld [vmem:[#allocation5 + $0x6f0] sm:$0xff] }
  0xd1   :  { %973 = vmatpush2.msra.mxu0 %v510_v1  ;;  %1044 = vmatpush2.msra.mxu1 %v512_v19  ;;  %v259_v1 = vld [vmem:[#allocation5 + $0x668] sm:$0xff]  ;;  %v261_v19 = vld [vmem:[#allocation5 + $0x678] sm:$0xff] }
  0xd2   :  { %974 = vmatprep.subr.mxu0 %v495_v20  ;;  %1045 = vmatprep.subr.mxu1 %v497_v21  ;;  %v258_v20 = vld [vmem:[#allocation5 + $0x660] sm:$0xff]  ;;  %v260_v21 = vld [vmem:[#allocation5 + $0x670] sm:$0xff] }
  0xd3   :  { %975 = vmatpush2.msra.mxu0 %v494_v22  ;;  %1046 = vmatpush2.msra.mxu1 %v496_v23  ;;  %v243_v22 = vld [vmem:[#allocation5 + $0x5e8] sm:$0xff]  ;;  %v245_v23 = vld [vmem:[#allocation5 + $0x5f8] sm:$0xff] }
  0xd4   :  { %976 = vmatprep.subr.mxu0 %v479_v24  ;;  %1047 = vmatprep.subr.mxu1 %v481_v25  ;;  %v242_v24 = vld [vmem:[#allocation5 + $0x5e0] sm:$0xff]  ;;  %v244_v25 = vld [vmem:[#allocation5 + $0x5f0] sm:$0xff] }
  0xd5   :  { %977 = vmatpush2.msra.mxu0 %v478_v26  ;;  %1048 = vmatpush2.msra.mxu1 %v480_v27  ;;  %v227_v26 = vld [vmem:[#allocation5 + $0x568] sm:$0xff]  ;;  %v229_v27 = vld [vmem:[#allocation5 + $0x578] sm:$0xff] }
  0xd6   :  { %978 = vmatprep.subr.mxu0 %v463_v28  ;;  %1049 = vmatprep.subr.mxu1 %v465_v29  ;;  %v226_v28 = vld [vmem:[#allocation5 + $0x560] sm:$0xff]  ;;  %v228_v29 = vld [vmem:[#allocation5 + $0x570] sm:$0xff] }
  0xd7   :  { %979 = vmatpush2.msra.mxu0 %v462_v30  ;;  %1050 = vmatpush2.msra.mxu1 %v464_v31  ;;  %v211_v30 = vld [vmem:[#allocation5 + $0x4e8] sm:$0xff]  ;;  %v213_v31 = vld [vmem:[#allocation5 + $0x4f8] sm:$0xff] }
  0xd8   :  { %980 = vmatprep.subr.mxu0 %v447_v32  ;;  %1051 = vmatprep.subr.mxu1 %v449_v33  ;;  %v210_v32 = vld [vmem:[#allocation5 + $0x4e0] sm:$0xff]  ;;  %v212_v33 = vld [vmem:[#allocation5 + $0x4f0] sm:$0xff] }
  0xd9   :  { %981 = vmatpush2.msra.mxu0 %v446_v34  ;;  %1052 = vmatpush2.msra.mxu1 %v448_v35  ;;  %v195_v34 = vld [vmem:[#allocation5 + $0x468] sm:$0xff]  ;;  %v197_v35 = vld [vmem:[#allocation5 + $0x478] sm:$0xff] }
  0xda   :  { %982 = vmatprep.subr.mxu0 %v431_v36  ;;  %1053 = vmatprep.subr.mxu1 %v433_v37  ;;  %v194_v36 = vld [vmem:[#allocation5 + $0x460] sm:$0xff]  ;;  %v196_v37 = vld [vmem:[#allocation5 + $0x470] sm:$0xff] }
  0xdb   :  { %983 = vmatpush2.msra.mxu0 %v430_v38  ;;  %1054 = vmatpush2.msra.mxu1 %v432_v39  ;;  %v179_v38 = vld [vmem:[#allocation5 + $0x3e8] sm:$0xff]  ;;  %v181_v39 = vld [vmem:[#allocation5 + $0x3f8] sm:$0xff] }
  0xdc   :  { %984 = vmatprep.subr.mxu0 %v415_v40  ;;  %1055 = vmatprep.subr.mxu1 %v417_v41  ;;  %v178_v40 = vld [vmem:[#allocation5 + $0x3e0] sm:$0xff]  ;;  %v180_v41 = vld [vmem:[#allocation5 + $0x3f0] sm:$0xff] }
  0xdd   :  { %985 = vmatpush2.msra.mxu0 %v414_v42  ;;  %1056 = vmatpush2.msra.mxu1 %v416_v43  ;;  %v163_v42 = vld [vmem:[#allocation5 + $0x368] sm:$0xff]  ;;  %v165_v43 = vld [vmem:[#allocation5 + $0x378] sm:$0xff] }
  0xde   :  { %986 = vmatprep.subr.mxu0 %v399_v44  ;;  %1057 = vmatprep.subr.mxu1 %v401_v45  ;;  %v162_v44 = vld [vmem:[#allocation5 + $0x360] sm:$0xff]  ;;  %v164_v45 = vld [vmem:[#allocation5 + $0x370] sm:$0xff] }
  0xdf   :  { %987 = vmatpush2.msra.mxu0 %v398_v46  ;;  %1058 = vmatpush2.msra.mxu1 %v400_v47  ;;  %v147_v46 = vld [vmem:[#allocation5 + $0x2e8] sm:$0xff]  ;;  %v149_v47 = vld [vmem:[#allocation5 + $0x2f8] sm:$0xff] }
  0xe0   :  { %988 = vmatprep.subr.mxu0 %v383_v48  ;;  %1059 = vmatprep.subr.mxu1 %v385_v49  ;;  %v146_v48 = vld [vmem:[#allocation5 + $0x2e0] sm:$0xff]  ;;  %v148_v49 = vld [vmem:[#allocation5 + $0x2f0] sm:$0xff] }
  0xe1   :  { %989 = vmatpush2.msra.mxu0 %v382_v50  ;;  %1060 = vmatpush2.msra.mxu1 %v384_v51  ;;  %v131_v50 = vld [vmem:[#allocation5 + $0x268] sm:$0xff]  ;;  %v133_v51 = vld [vmem:[#allocation5 + $0x278] sm:$0xff] }
  0xe2   :  { %990 = vmatprep.subr.mxu0 %v367_v52  ;;  %1061 = vmatprep.subr.mxu1 %v369_v53  ;;  %v130_v52 = vld [vmem:[#allocation5 + $0x260] sm:$0xff]  ;;  %v132_v53 = vld [vmem:[#allocation5 + $0x270] sm:$0xff] }
  0xe3   :  { %991 = vmatpush2.msra.mxu0 %v366_v54  ;;  %1062 = vmatpush2.msra.mxu1 %v368_v55  ;;  %v115_v54 = vld [vmem:[#allocation5 + $0x1e8] sm:$0xff]  ;;  %v117_v55 = vld [vmem:[#allocation5 + $0x1f8] sm:$0xff] }
  0xe4   :  { %992 = vmatprep.subr.mxu0 %v351_v56  ;;  %1063 = vmatprep.subr.mxu1 %v353_v57  ;;  %v114_v56 = vld [vmem:[#allocation5 + $0x1e0] sm:$0xff]  ;;  %v116_v57 = vld [vmem:[#allocation5 + $0x1f0] sm:$0xff] }
  0xe5   :  { %993 = vmatpush2.msra.mxu0 %v350_v58  ;;  %1064 = vmatpush2.msra.mxu1 %v352_v59  ;;  %v99_v58 = vld [vmem:[#allocation5 + $0x168] sm:$0xff]  ;;  %v101_v59 = vld [vmem:[#allocation5 + $0x178] sm:$0xff] }
  0xe6   :  { %994 = vmatprep.subr.mxu0 %v335_v60  ;;  %1065 = vmatprep.subr.mxu1 %v337_v61  ;;  %v98_v60 = vld [vmem:[#allocation5 + $0x160] sm:$0xff]  ;;  %v100_v61 = vld [vmem:[#allocation5 + $0x170] sm:$0xff] }
  0xe7   :  { %995 = vmatpush2.msra.mxu0 %v334_v62  ;;  %1066 = vmatpush2.msra.mxu1 %v336_v0  ;;  %v83_v62 = vld [vmem:[#allocation5 + $0xe8] sm:$0xff]  ;;  %v85_v0 = vld [vmem:[#allocation5 + $0xf8] sm:$0xff] }
  0xe8   :  { %996 = vmatprep.subr.mxu0 %v319_v2  ;;  %1067 = vmatprep.subr.mxu1 %v321_v3  ;;  %v82_v2 = vld [vmem:[#allocation5 + $0xe0] sm:$0xff]  ;;  %v84_v3 = vld [vmem:[#allocation5 + $0xf0] sm:$0xff] }
  0xe9   :  { %997 = vmatpush2.msra.mxu0 %v318_v4  ;;  %998 = vmatprep.mubr.f32.mxu0 %v1391_v6  ;;  %v67_v4 = vld [vmem:[#allocation5 + $0x68] sm:$0xff] }
  0xea   :  { %1068 = vmatpush2.msra.mxu1 %v320_v5  ;;  %1069 = vmatprep.mubr.f32.mxu1 %v1391_v6  ;;  %v69_v5 = vld [vmem:[#allocation5 + $0x78] sm:$0xff] }
  0xeb   :  { %999 = vmatmul.mubr.f32.vlgmr.msra.gmra.mxu0 %v1395_v11  ;;  %1070 = vmatmul.mubr.f32.vlgmr.msra.gmra.mxu1 %v1395_v11 }
  0xec   :  { %1076 = vmatprep.subr.mxu0 %v307_v7  ;;  %1147 = vmatprep.subr.mxu1 %v309_v8  ;;  %v66_v7 = vld [vmem:[#allocation5 + $0x60] sm:$0xff]  ;;  %v68_v8 = vld [vmem:[#allocation5 + $0x70] sm:$0xff] }
  0xed   :  { %1077 = vmatpush1.msra.mxu0 %v306_v9  ;;  %1148 = vmatpush1.msra.mxu1 %v308_v10  ;;  %v563_v9 = vld [vmem:[#allocation5 + $0xfe8] sm:$0xff]  ;;  %v565_v10 = vld [vmem:[#allocation5 + $0xff8] sm:$0xff] }
  0xee   :  { %1078 = vmatprep.subr.mxu0 %v291_v12  ;;  %1149 = vmatprep.subr.mxu1 %v293_v13  ;;  %v562_v12 = vld [vmem:[#allocation5 + $0xfe0] sm:$0xff]  ;;  %v564_v13 = vld [vmem:[#allocation5 + $0xff0] sm:$0xff] }
  0xef   :  { %1079 = vmatpush1.msra.mxu0 %v290_v14  ;;  %1150 = vmatpush1.msra.mxu1 %v292_v15  ;;  %v547_v14 = vld [vmem:[#allocation5 + $0xf68] sm:$0xff]  ;;  %v549_v15 = vld [vmem:[#allocation5 + $0xf78] sm:$0xff] }
  0xf0   :  { %1080 = vmatprep.subr.mxu0 %v275_v16  ;;  %1151 = vmatprep.subr.mxu1 %v277_v63  ;;  %v546_v16 = vld [vmem:[#allocation5 + $0xf60] sm:$0xff]  ;;  %v548_v63 = vld [vmem:[#allocation5 + $0xf70] sm:$0xff] }
  0xf1   :  { %1081 = vmatpush1.msra.mxu0 %v274_v17  ;;  %1152 = vmatpush1.msra.mxu1 %v276_v18  ;;  %v531_v17 = vld [vmem:[#allocation5 + $0xee8] sm:$0xff]  ;;  %v533_v18 = vld [vmem:[#allocation5 + $0xef8] sm:$0xff] }
  0xf2   :  { %1082 = vmatprep.subr.mxu0 %v259_v1  ;;  %1153 = vmatprep.subr.mxu1 %v261_v19  ;;  %v530_v1 = vld [vmem:[#allocation5 + $0xee0] sm:$0xff]  ;;  %v532_v19 = vld [vmem:[#allocation5 + $0xef0] sm:$0xff] }
  0xf3   :  { %1083 = vmatpush1.msra.mxu0 %v258_v20  ;;  %1154 = vmatpush1.msra.mxu1 %v260_v21  ;;  %v515_v20 = vld [vmem:[#allocation5 + $0xe68] sm:$0xff]  ;;  %v517_v21 = vld [vmem:[#allocation5 + $0xe78] sm:$0xff] }
  0xf4   :  { %1084 = vmatprep.subr.mxu0 %v243_v22  ;;  %1155 = vmatprep.subr.mxu1 %v245_v23  ;;  %v514_v22 = vld [vmem:[#allocation5 + $0xe60] sm:$0xff]  ;;  %v516_v23 = vld [vmem:[#allocation5 + $0xe70] sm:$0xff] }
  0xf5   :  { %1085 = vmatpush1.msra.mxu0 %v242_v24  ;;  %1156 = vmatpush1.msra.mxu1 %v244_v25  ;;  %v499_v24 = vld [vmem:[#allocation5 + $0xde8] sm:$0xff]  ;;  %v501_v25 = vld [vmem:[#allocation5 + $0xdf8] sm:$0xff] }
  0xf6   :  { %1086 = vmatprep.subr.mxu0 %v227_v26  ;;  %1157 = vmatprep.subr.mxu1 %v229_v27  ;;  %v498_v26 = vld [vmem:[#allocation5 + $0xde0] sm:$0xff]  ;;  %v500_v27 = vld [vmem:[#allocation5 + $0xdf0] sm:$0xff] }
  0xf7   :  { %1087 = vmatpush1.msra.mxu0 %v226_v28  ;;  %1158 = vmatpush1.msra.mxu1 %v228_v29  ;;  %v483_v28 = vld [vmem:[#allocation5 + $0xd68] sm:$0xff]  ;;  %v485_v29 = vld [vmem:[#allocation5 + $0xd78] sm:$0xff] }
  0xf8   :  { %1088 = vmatprep.subr.mxu0 %v211_v30  ;;  %1159 = vmatprep.subr.mxu1 %v213_v31  ;;  %v482_v30 = vld [vmem:[#allocation5 + $0xd60] sm:$0xff]  ;;  %v484_v31 = vld [vmem:[#allocation5 + $0xd70] sm:$0xff] }
  0xf9   :  { %1089 = vmatpush1.msra.mxu0 %v210_v32  ;;  %1160 = vmatpush1.msra.mxu1 %v212_v33  ;;  %v467_v32 = vld [vmem:[#allocation5 + $0xce8] sm:$0xff]  ;;  %v469_v33 = vld [vmem:[#allocation5 + $0xcf8] sm:$0xff] }
  0xfa   :  { %1090 = vmatprep.subr.mxu0 %v195_v34  ;;  %1161 = vmatprep.subr.mxu1 %v197_v35  ;;  %v466_v34 = vld [vmem:[#allocation5 + $0xce0] sm:$0xff]  ;;  %v468_v35 = vld [vmem:[#allocation5 + $0xcf0] sm:$0xff] }
  0xfb   :  { %1091 = vmatpush1.msra.mxu0 %v194_v36  ;;  %1162 = vmatpush1.msra.mxu1 %v196_v37  ;;  %v451_v36 = vld [vmem:[#allocation5 + $0xc68] sm:$0xff]  ;;  %v453_v37 = vld [vmem:[#allocation5 + $0xc78] sm:$0xff] }
  0xfc   :  { %1092 = vmatprep.subr.mxu0 %v179_v38  ;;  %1163 = vmatprep.subr.mxu1 %v181_v39  ;;  %v450_v38 = vld [vmem:[#allocation5 + $0xc60] sm:$0xff]  ;;  %v452_v39 = vld [vmem:[#allocation5 + $0xc70] sm:$0xff] }
  0xfd   :  { %1093 = vmatpush1.msra.mxu0 %v178_v40  ;;  %1164 = vmatpush1.msra.mxu1 %v180_v41  ;;  %v570_v40 = vlaneseq  ;;  %v435_v41 = vld [vmem:[#allocation5 + $0xbe8] sm:$0xff] }
  0xfe   :  { %1094 = vmatprep.subr.mxu0 %v163_v42  ;;  %1165 = vmatprep.subr.mxu1 %v165_v43  ;;  %v437_v42 = vld [vmem:[#allocation5 + $0xbf8] sm:$0xff]  ;;  %v434_v43 = vld [vmem:[#allocation5 + $0xbe0] sm:$0xff] }
  0xff   :  { %1095 = vmatpush1.msra.mxu0 %v162_v44  ;;  %1166 = vmatpush1.msra.mxu1 %v164_v45  ;;  %v436_v44 = vld [vmem:[#allocation5 + $0xbf0] sm:$0xff]  ;;  %v419_v45 = vld [vmem:[#allocation5 + $0xb68] sm:$0xff] }
 0x100   :  { %1096 = vmatprep.subr.mxu0 %v147_v46  ;;  %1167 = vmatprep.subr.mxu1 %v149_v47  ;;  %v421_v46 = vld [vmem:[#allocation5 + $0xb78] sm:$0xff]  ;;  %v418_v47 = vld [vmem:[#allocation5 + $0xb60] sm:$0xff] }
 0x101   :  { %1097 = vmatpush1.msra.mxu0 %v146_v48  ;;  %1168 = vmatpush1.msra.mxu1 %v148_v49  ;;  %v420_v48 = vld [vmem:[#allocation5 + $0xb70] sm:$0xff]  ;;  %v1399_v49 = vshrl.u32 %v570_v40, 7 }
 0x102   :  { %1098 = vmatprep.subr.mxu0 %v131_v50  ;;  %1169 = vmatprep.subr.mxu1 %v133_v51  ;;  %v403_v50 = vld [vmem:[#allocation5 + $0xae8] sm:$0xff]  ;;  %v405_v51 = vld [vmem:[#allocation5 + $0xaf8] sm:$0xff] }
 0x103   :  { %1099 = vmatpush1.msra.mxu0 %v130_v52  ;;  %1170 = vmatpush1.msra.mxu1 %v132_v53  ;;  %v402_v52 = vld [vmem:[#allocation5 + $0xae0] sm:$0xff]  ;;  %v404_v53 = vld [vmem:[#allocation5 + $0xaf0] sm:$0xff] }
 0x104   :  { %1100 = vmatprep.subr.mxu0 %v115_v54  ;;  %1171 = vmatprep.subr.mxu1 %v117_v55  ;;  %v387_v54 = vld [vmem:[#allocation5 + $0xa68] sm:$0xff]  ;;  %v389_v55 = vld [vmem:[#allocation5 + $0xa78] sm:$0xff] }
 0x105   :  { %1101 = vmatpush1.msra.mxu0 %v114_v56  ;;  %1172 = vmatpush1.msra.mxu1 %v116_v57  ;;  %v386_v56 = vld [vmem:[#allocation5 + $0xa60] sm:$0xff]  ;;  %v388_v57 = vld [vmem:[#allocation5 + $0xa70] sm:$0xff] }
 0x106   :  { %1102 = vmatprep.subr.mxu0 %v99_v58  ;;  %1173 = vmatprep.subr.mxu1 %v101_v59  ;;  %v572_v58 = vsub.s32 0, %v1399_v49  ;;  %v580_v59 = vsub.s32 2, %v1399_v49 }
 0x107   :  { %1103 = vmatpush1.msra.mxu0 %v98_v60  ;;  %1174 = vmatpush1.msra.mxu1 %v100_v61  ;;  %v371_v60 = vld [vmem:[#allocation5 + $0x9e8] sm:$0xff]  ;;  %v373_v61 = vld [vmem:[#allocation5 + $0x9f8] sm:$0xff] }
 0x108   :  { %1104 = vmatprep.subr.mxu0 %v83_v62  ;;  %1175 = vmatprep.subr.mxu1 %v85_v0  ;;  %v1403_v62 = vld [vmem:[#allocation7] sm:$0xff] }
 0x109   :  { %1105 = vmatpush1.msra.mxu0 %v82_v2  ;;  %1176 = vmatpush1.msra.mxu1 %v84_v3  ;;  %v370_v0 = vld [vmem:[#allocation5 + $0x9e0] sm:$0xff]  ;;  %v372_v2 = vld [vmem:[#allocation5 + $0x9f0] sm:$0xff]  ;;  %v576_v3 = vsub.s32 1, %v1399_v49 }
 0x10a   :  { %1106 = vmatprep.subr.mxu0 %v67_v4  ;;  %1177 = vmatprep.subr.mxu1 %v69_v5  ;;  %v584_v4 = vsub.s32 3, %v1399_v49  ;;  %v355_v5 = vld [vmem:[#allocation5 + $0x968] sm:$0xff] }
 0x10b   :  { %1107 = vmatpush1.msra.mxu0 %v66_v7  ;;  %1178 = vmatpush1.msra.mxu1 %v68_v8  ;;  %v357_v7 = vld [vmem:[#allocation5 + $0x978] sm:$0xff]  ;;  %v354_v8 = vld [vmem:[#allocation5 + $0x960] sm:$0xff] }
 0x10c   :  { %1108 = vmatprep.subr.mxu0 %v563_v9  ;;  %1179 = vmatprep.subr.mxu1 %v565_v10  ;;  %v356_v9 = vld [vmem:[#allocation5 + $0x970] sm:$0xff]  ;;  %v573_v10 = vrot.slane %v1403_v62, %v572_v58 }
 0x10d   :  { %1109 = vmatpush2.msra.mxu0 %v562_v12  ;;  %1180 = vmatpush2.msra.mxu1 %v564_v13  ;;  %v581_v12 = vrot.slane %v1403_v62, %v580_v59  ;;  %v339_v13 = vld [vmem:[#allocation5 + $0x8e8] sm:$0xff] }
 0x10e   :  { %1110 = vmatprep.subr.mxu0 %v547_v14  ;;  %1181 = vmatprep.subr.mxu1 %v549_v15  ;;  %v341_v14 = vld [vmem:[#allocation5 + $0x8f8] sm:$0xff]  ;;  %v338_v15 = vld [vmem:[#allocation5 + $0x8e0] sm:$0xff] }
 0x10f   :  { %1111 = vmatpush2.msra.mxu0 %v546_v16  ;;  %1182 = vmatpush2.msra.mxu1 %v548_v63  ;;  %v340_v16 = vld [vmem:[#allocation5 + $0x8f0] sm:$0xff]  ;;  %v577_v63 = vrot.slane %v1403_v62, %v576_v3 }
 0x110   :  { %1112 = vmatprep.subr.mxu0 %v531_v17  ;;  %1183 = vmatprep.subr.mxu1 %v533_v18  ;;  %v585_v17 = vrot.slane %v1403_v62, %v584_v4  ;;  %v323_v18 = vld [vmem:[#allocation5 + $0x868] sm:$0xff] }
 0x111   :  { %1113 = vmatpush2.msra.mxu0 %v530_v1  ;;  %1184 = vmatpush2.msra.mxu1 %v532_v19  ;;  %v325_v1 = vld [vmem:[#allocation5 + $0x878] sm:$0xff] }
 0x112   :  { %1114 = vmatprep.subr.mxu0 %v515_v20  ;;  %1185 = vmatprep.subr.mxu1 %v517_v21  ;;  %v322_v21 = vld [vmem:[#allocation5 + $0x860] sm:$0xff] }
 0x113   :  { %1115 = vmatpush2.msra.mxu0 %v514_v22  ;;  %1186 = vmatpush2.msra.mxu1 %v516_v23 }
 0x114   :  { %1116 = vmatprep.subr.mxu0 %v499_v24  ;;  %1187 = vmatprep.subr.mxu1 %v501_v25  ;;  %v324_v24 = vld [vmem:[#allocation5 + $0x870] sm:$0xff] }
 0x115   :  { %1117 = vmatpush2.msra.mxu0 %v498_v26  ;;  %1188 = vmatpush2.msra.mxu1 %v500_v27 }
 0x116   :  { %1118 = vmatprep.subr.mxu0 %v483_v28  ;;  %1189 = vmatprep.subr.mxu1 %v485_v29  ;;  %v588_v29 = vsub.s32 4, %v1399_v49 }
 0x117   :  { %1119 = vmatpush2.msra.mxu0 %v482_v30  ;;  %1190 = vmatpush2.msra.mxu1 %v484_v31  ;;  %v596_v30 = vsub.s32 6, %v1399_v49  ;;  %v592_v31 = vsub.s32 5, %v1399_v49 }
 0x118   :  { %1120 = vmatprep.subr.mxu0 %v467_v32  ;;  %1191 = vmatprep.subr.mxu1 %v469_v33  ;;  %v600_v32 = vsub.s32 7, %v1399_v49  ;;  %v589_v33 = vrot.slane %v1403_v62, %v588_v29 }
 0x119   :  { %1121 = vmatpush2.msra.mxu0 %v466_v34  ;;  %1192 = vmatpush2.msra.mxu1 %v468_v35  ;;  %v597_v34 = vrot.slane %v1403_v62, %v596_v30 }
 0x11a   :  { %1122 = vmatprep.subr.mxu0 %v451_v36  ;;  %1193 = vmatprep.subr.mxu1 %v453_v37  ;;  %v601_v35 = vrot.slane %v1403_v62, %v600_v32 }
 0x11b   :  { %1123 = vmatpush2.msra.mxu0 %v450_v38  ;;  %1194 = vmatpush2.msra.mxu1 %v452_v39 }
 0x11c   :  { %1124 = vmatprep.subr.mxu0 %v435_v41  ;;  %1195 = vmatprep.subr.mxu1 %v437_v42 }
 0x11d   :  { %1125 = vmatpush2.msra.mxu0 %v434_v43  ;;  %1196 = vmatpush2.msra.mxu1 %v436_v44  ;;  %v567_v43 = vld [vmem:[#allocation7 + $0x8] sm:$0xff] }
 0x11e   :  { %1126 = vmatprep.subr.mxu0 %v419_v45  ;;  %1197 = vmatprep.subr.mxu1 %v421_v46  ;;  %v605_v44 = vrot.slane %v567_v43, %v572_v58  ;;  %v613_v45 = vrot.slane %v567_v43, %v580_v59  ;;  %v609_v46 = vrot.slane %v567_v43, %v576_v3 }
 0x11f   :  { %1127 = vmatpush2.msra.mxu0 %v418_v47  ;;  %1198 = vmatpush2.msra.mxu1 %v420_v48  ;;  %v617_v47 = vrot.slane %v567_v43, %v584_v4  ;;  %v629_v58 = vrot.slane %v567_v43, %v596_v30  ;;  %v625_v59 = vrot.slane %v567_v43, %v592_v31 }
 0x120   :  { %1128 = vmatprep.subr.mxu0 %v403_v50  ;;  %1199 = vmatprep.subr.mxu1 %v405_v51 }
 0x121   :  { %1129 = vmatpush2.msra.mxu0 %v402_v52  ;;  %1200 = vmatpush2.msra.mxu1 %v404_v53 }
 0x122   :  { %1130 = vmatprep.subr.mxu0 %v387_v54  ;;  %1201 = vmatprep.subr.mxu1 %v389_v55 }
 0x123   :  { %1131 = vmatpush2.msra.mxu0 %v386_v56  ;;  %1202 = vmatpush2.msra.mxu1 %v388_v57  ;;  %v621_v57 = vrot.slane %v567_v43, %v588_v29 }
 0x124   :  { %1132 = vmatprep.subr.mxu0 %v371_v60  ;;  %1203 = vmatprep.subr.mxu1 %v373_v61  ;;  %v633_v60 = vrot.slane %v567_v43, %v600_v32 }
 0x125   :  { %1133 = vmatpush2.msra.mxu0 %v370_v0  ;;  %1204 = vmatpush2.msra.mxu1 %v372_v2 }
 0x126   :  { %1134 = vmatprep.subr.mxu0 %v355_v5  ;;  %1205 = vmatprep.subr.mxu1 %v357_v7 }
 0x127   :  { %1135 = vmatpush2.msra.mxu0 %v354_v8  ;;  %1206 = vmatpush2.msra.mxu1 %v356_v9  ;;  %v716_v19 = vpop.f32.mrf.mxu0  ;;  %v787_v20 = vpop.f32.mrf.mxu1 }
 0x128   :  { %1136 = vmatprep.subr.mxu0 %v339_v13  ;;  %1207 = vmatprep.subr.mxu1 %v341_v14  ;;  %v717_v22 = vadd.f32 %v716_v19, %v573_v10  ;;  %v788_v23 = vadd.f32 %v787_v20, %v581_v12 }
 0x129   :  { %1137 = vmatpush2.msra.mxu0 %v338_v15  ;;  %1208 = vmatpush2.msra.mxu1 %v340_v16  ;;  %v718_v25 = vpop.f32.mrf.mxu0  ;;  %v789_v26 = vpop.f32.mrf.mxu1 }
 0x12a   :  { %1138 = vmatprep.subr.mxu0 %v323_v18  ;;  %1209 = vmatprep.subr.mxu1 %v325_v1  ;;  %1218 = vst [vmem:[#allocation8] sm:$0xff] %v717_v22  ;;  %1220 = vst [vmem:[#allocation8 + $0x10] sm:$0xff] %v788_v23  ;;  %v719_v27 = vadd.f32 %v718_v25, %v577_v63  ;;  %v790_v28 = vadd.f32 %v789_v26, %v585_v17 }
 0x12b   :  { %1139 = vmatpush2.msra.mxu0 %v322_v21  ;;  %1140 = vmatprep.mubr.f32.mxu0 %v1391_v6 }
 0x12c   :  { %1210 = vmatpush2.msra.mxu1 %v324_v24  ;;  %1211 = vmatprep.mubr.f32.mxu1 %v1391_v6  ;;  %1219 = vst [vmem:[#allocation8 + $0x8] sm:$0xff] %v719_v27  ;;  %1221 = vst [vmem:[#allocation8 + $0x18] sm:$0xff] %v790_v28  ;;  %v593_v6 = vrot.slane %v1403_v62, %v592_v31 }
 0x12d   :  { %1141 = vmatmul.mubr.f32.vlgmr.msra.gmra.mxu0 %v1395_v11  ;;  %1212 = vmatmul.mubr.f32.vlgmr.msra.gmra.mxu1 %v1395_v11 }
 0x169   :  { %v858_v36 = vpop.f32.mrf.mxu0  ;;  %v929_v37 = vpop.f32.mrf.mxu1 }
 0x16a   :  { %v859_v38 = vadd.f32 %v858_v36, %v589_v33  ;;  %v930_v11 = vadd.f32 %v929_v37, %v597_v34 }
 0x16b   :  { %v860_v39 = vpop.f32.mrf.mxu0  ;;  %v931_v40 = vpop.f32.mrf.mxu1 }
 0x16c   :  { %1222 = vst [vmem:[#allocation8 + $0x20] sm:$0xff] %v859_v38  ;;  %1224 = vst [vmem:[#allocation8 + $0x30] sm:$0xff] %v930_v11  ;;  %v861_v41 = vadd.f32 %v860_v39, %v593_v6  ;;  %v932_v42 = vadd.f32 %v931_v40, %v601_v35 }
 0x16e   :  { %1223 = vst [vmem:[#allocation8 + $0x28] sm:$0xff] %v861_v41  ;;  %1225 = vst [vmem:[#allocation8 + $0x38] sm:$0xff] %v932_v42 }
 0x1ab   :  { %v1000_v48 = vpop.f32.mrf.mxu0  ;;  %v1071_v50 = vpop.f32.mrf.mxu1 }
 0x1ac   :  { %v1001_v51 = vadd.f32 %v1000_v48, %v605_v44  ;;  %v1072_v52 = vadd.f32 %v1071_v50, %v613_v45 }
 0x1ad   :  { %v1002_v53 = vpop.f32.mrf.mxu0  ;;  %v1073_v54 = vpop.f32.mrf.mxu1 }
 0x1ae   :  { %1226 = vst [vmem:[#allocation8 + $0x40] sm:$0xff] %v1001_v51  ;;  %1228 = vst [vmem:[#allocation8 + $0x50] sm:$0xff] %v1072_v52  ;;  %v1003_v55 = vadd.f32 %v1002_v53, %v609_v46  ;;  %v1074_v56 = vadd.f32 %v1073_v54, %v617_v47 }
 0x1b0   :  { %1227 = vst [vmem:[#allocation8 + $0x48] sm:$0xff] %v1003_v55  ;;  %1229 = vst [vmem:[#allocation8 + $0x58] sm:$0xff] %v1074_v56 }
 0x1ed   :  { %v1142_v61 = vpop.f32.mrf.mxu0  ;;  %v1213_v62 = vpop.f32.mrf.mxu1 }
 0x1ee   :  { %v1143_v49 = vadd.f32 %v1142_v61, %v621_v57  ;;  %v1214_v0 = vadd.f32 %v1213_v62, %v629_v58 }
 0x1ef   :  { %v1144_v2 = vpop.f32.mrf.mxu0  ;;  %v1215_v3 = vpop.f32.mrf.mxu1 }
 0x1f0   :  { %1230 = vst [vmem:[#allocation8 + $0x60] sm:$0xff] %v1143_v49  ;;  %1232 = vst [vmem:[#allocation8 + $0x70] sm:$0xff] %v1214_v0  ;;  %v1145_v4 = vadd.f32 %v1144_v2, %v625_v59  ;;  %v1216_v5 = vadd.f32 %v1215_v3, %v633_v60 }
 0x1f2   :  { %1231 = vst [vmem:[#allocation8 + $0x68] sm:$0xff] %v1145_v4  ;;  %1233 = vst [vmem:[#allocation8 + $0x78] sm:$0xff] %v1216_v5 }
 0x1f3   :  { %1329 = shalt.err (!%p1326_p5)
}
 0x1f4   :  { %1243 = dma.vmem_to_hbm [thread:$0]  %s1241_s2, 2048, %s1445_s3, [#allocation4]  }
 0x1f5   :  { %1342 = dma.done.wait [#allocation4], 2048  }
 0x1f6   :  { %1343 = vsyncadd [#allocation4], 4294965248 }
 0x1f7   :  { %1247 = vsyncpa [#allocation3], 1 }
 0x1f8   :  { %1248 = vsyncpa [#allocation6], 1 }
 0x1f9   :  { %1249 = vsyncpa [#allocation4], 1 }

</bundles_post_ra>
